<compile_context>
chip_gen: v7x
topology: tpu7x:2x2x1
jax: 0.10.0
libtpu: 0.0.40
codegen_flags: <defaults>
</compile_context>

<pallas_src>
import jax
import jax.numpy as jnp
from jax.experimental import pallas as pl
from jax.experimental.pallas import tpu as pltpu


def _round_up(n, m):
    return (n + m - 1) // m * m


def channel_attention_kernel(x_ref, w1_ref, w2_ref, o_ref):
    # x_ref : (TB, C) batch tile   w1_ref : (C, H)   w2_ref : (H, C)   o_ref : (TB, C)
    x = x_ref[...]
    # AdaptiveAvgPool1d(1) over a length-1 trailing dim is the identity: y = x.
    xm = x.astype(w1_ref.dtype)                               # bf16 MXU operands
    h = jnp.dot(xm, w1_ref[...], preferred_element_type=jnp.float32)
    h = jnp.maximum(h, 0.0)                                   # ReLU (f32)
    y = jnp.dot(h.astype(w2_ref.dtype), w2_ref[...],
                preferred_element_type=jnp.float32)
    gate = jax.nn.sigmoid(y)                                  # f32 on EUP
    o_ref[...] = (x.astype(jnp.float32) * gate).astype(o_ref.dtype)


def channel_attention(x, w1_t, w2_t, *, block_b=2048, min_tiles=2):
    """x: (B, C) bf16/f32; w1_t: (C, H) bf16; w2_t: (H, C) bf16 -> (B, C) same dtype as x.

    x's HBM buffer is donated to the output (input_output_aliases); do not reuse x after.
    """
    B, C = x.shape
    H = w1_t.shape[1]
    itemsize = jnp.dtype(x.dtype).itemsize
    sub = 16 if x.dtype == jnp.bfloat16 else 8                # sublane packing

    # Pick TB: at least `min_tiles` tiles when possible (v7x megacore sharding),
    # capped at block_b, multiple of the sublane packing.  Ragged tail is handled
    # by Pallas boundary masking (no pad / slice HBM copies).
    n_tiles = max(min_tiles, pl.cdiv(B, block_b))
    TB = _round_up(pl.cdiv(B, n_tiles), sub)
    if TB >= B:
        TB = B                                                # single full-extent block (legal)
    grid = (pl.cdiv(B, TB),)

    flops = 2 * B * C * H + 2 * B * H * C + 3 * B * C         # two matmuls + relu/gate
    bytes_accessed = 2 * B * C * itemsize + 2 * C * H * jnp.dtype(w1_t.dtype).itemsize

    out = pl.pallas_call(
        channel_attention_kernel,
        out_shape=jax.ShapeDtypeStruct((B, C), x.dtype),
        grid_spec=pl.GridSpec(
            grid=grid,
            in_specs=[
                pl.BlockSpec((TB, C), lambda i: (i, 0)),      # x: streamed batch tiles
                pl.BlockSpec((C, H), lambda i: (0, 0),        # W1: VMEM-resident,
                             pipeline_mode=pl.Buffered(1)),   #     single-buffered
                pl.BlockSpec((H, C), lambda i: (0, 0),        # W2: VMEM-resident,
                             pipeline_mode=pl.Buffered(1)),   #     single-buffered
            ],
            out_specs=pl.BlockSpec((TB, C), lambda i: (i, 0)),
        ),
        input_output_aliases={0: 0},                          # donate x's HBM buffer
        compiler_params=pltpu.CompilerParams(
            dimension_semantics=("parallel",),                # megacore-shard batch tiles
            vmem_limit_bytes=32 * 1024 * 1024,
        ),
        cost_estimate=pl.CostEstimate(
            flops=flops,
            transcendentals=B * C,                            # sigmoid
            bytes_accessed=bytes_accessed,
        ),
    )(x, w1_t, w2_t)

    return out


def reference(x_f32, w1_t_f32, w2_t_f32):
    y = x_f32                                                 # identity avg-pool
    h = jnp.maximum(y @ w1_t_f32, 0.0)
    y = h @ w2_t_f32
    return x_f32 * jax.nn.sigmoid(y)


if __name__ == "__main__":
    B, C = 2048, 128             # batch, in_channels (C multiple of 128 -> lane-dense I/O)
    reduction_ratio = 2
    Hc = C // reduction_ratio    # bottleneck hidden size

    key = jax.random.PRNGKey(0)
    kx, k1, k2 = jax.random.split(key, 3)

    # Streamed activation in bf16 (the model is assumed to hold activations in bf16;
    # constructing it in bf16 avoids an extra HBM cast pass in front of the kernel).
    x = jax.random.normal(kx, (B, C), dtype=jnp.float32).astype(jnp.bfloat16)
    # nn.Linear weights: W1 (H, C), W2 (C, H); store transposed (in, out) and in bf16.
    w1 = (jax.random.normal(k1, (Hc, C), dtype=jnp.float32) * 0.1)
    w2 = (jax.random.normal(k2, (C, Hc), dtype=jnp.float32) * 0.1)
    w1_t = jnp.asarray(w1.T, dtype=jnp.bfloat16)              # (C, H)
    w2_t = jnp.asarray(w2.T, dtype=jnp.bfloat16)              # (H, C)

    # Compute the reference BEFORE the kernel call: the kernel donates x's buffer.
    ref = reference(x.astype(jnp.float32),
                    w1_t.astype(jnp.float32),
                    w2_t.astype(jnp.float32))

    # block_b=1024 with B=2048 -> TB=1024, grid=(2,): exercises tiling + both v7x cores.
    out = channel_attention(x, w1_t, w2_t, block_b=1024)
    out = jax.block_until_ready(out)

    assert out.shape == (B, C)
    assert out.dtype == jnp.bfloat16
    # bf16 activations/output -> loosened tolerance vs the f32 reference.
    assert jnp.allclose(out.astype(jnp.float32), ref, atol=5e-2, rtol=5e-2), \
        "mismatch vs reference"

    print("KERNEL_OK")
</pallas_src>

<mosaic_0001>
module attributes {stable_mosaic.version = 11 : i64} {
  func.func @channel_attention_kernel(%arg0: i32, %arg1: memref<1024x128xbf16, #tpu.memory_space<vmem>>, %arg2: memref<128x64xbf16, #tpu.memory_space<vmem>>, %arg3: memref<64x128xbf16, #tpu.memory_space<vmem>>, %arg4: memref<1024x128xbf16, #tpu.memory_space<vmem>>) attributes {dimension_semantics = [#tpu.dimension_semantics<parallel>], iteration_bounds = array<i64: 2>, scalar_prefetch = 0 : i64, scratch_operands = 0 : i64, tpu.core_type = #tpu.core_type<tc>, window_params = [{transform_indices = @transform_0, window_bounds = array<i64: 1024, 128>}, {pipeline_mode = #tpu.pipeline_mode<synchronous>, transform_indices = @transform_1, window_bounds = array<i64: 128, 64>}, {pipeline_mode = #tpu.pipeline_mode<synchronous>, transform_indices = @transform_2, window_bounds = array<i64: 64, 128>}, {transform_indices = @transform_3, window_bounds = array<i64: 1024, 128>}]} {
    %c0 = arith.constant 0 : index
    %c0_0 = arith.constant 0 : index
    %0 = vector.load %arg1[%c0, %c0_0] : memref<1024x128xbf16, #tpu.memory_space<vmem>>, vector<1024x128xbf16>
    %c0_1 = arith.constant 0 : index
    %c0_2 = arith.constant 0 : index
    %1 = vector.load %arg2[%c0_1, %c0_2] : memref<128x64xbf16, #tpu.memory_space<vmem>>, vector<128x64xbf16>
    %cst = arith.constant dense<0.000000e+00> : vector<1024x64xf32>
    %2 = tpu.matmul %0, %1, %cst {dimension_numbers = #tpu.dot_dimension_numbers<[1], [0], [0], [1], [0, 0, 1, 1], [], []>} : vector<1024x128xbf16>, vector<128x64xbf16>, vector<1024x64xf32> -> vector<1024x64xf32>
    %cst_3 = arith.constant 0.000000e+00 : f32
    %3 = vector.broadcast %cst_3 : f32 to vector<1024x64xf32>
    %4 = arith.maximumf %2, %3 : vector<1024x64xf32>
    %5 = arith.truncf %4 : vector<1024x64xf32> to vector<1024x64xbf16>
    %c0_4 = arith.constant 0 : index
    %c0_5 = arith.constant 0 : index
    %6 = vector.load %arg3[%c0_4, %c0_5] : memref<64x128xbf16, #tpu.memory_space<vmem>>, vector<64x128xbf16>
    %cst_6 = arith.constant dense<0.000000e+00> : vector<1024x128xf32>
    %7 = tpu.matmul %5, %6, %cst_6 {dimension_numbers = #tpu.dot_dimension_numbers<[1], [0], [0], [1], [0, 0, 1, 1], [], []>} : vector<1024x64xbf16>, vector<64x128xbf16>, vector<1024x128xf32> -> vector<1024x128xf32>
    %8 = arith.negf %7 : vector<1024x128xf32>
    %9 = math.exp %8 : vector<1024x128xf32>
    %cst_7 = arith.constant 1.000000e+00 : f32
    %10 = vector.broadcast %cst_7 : f32 to vector<1024x128xf32>
    %11 = arith.addf %10, %9 : vector<1024x128xf32>
    %12 = arith.divf %10, %11 : vector<1024x128xf32>
    %13 = arith.extf %0 : vector<1024x128xbf16> to vector<1024x128xf32>
    %14 = arith.mulf %13, %12 : vector<1024x128xf32>
    %15 = arith.truncf %14 : vector<1024x128xf32> to vector<1024x128xbf16>
    %c0_8 = arith.constant 0 : index
    %c0_9 = arith.constant 0 : index
    %16 = vector.load %arg4[%c0_8, %c0_9] : memref<1024x128xbf16, #tpu.memory_space<vmem>>, vector<1024x128xbf16>
    tpu.vector_store %arg4[%c0_8, %c0_9], %15 {strides = array<i32>} : memref<1024x128xbf16, #tpu.memory_space<vmem>>, vector<1024x128xbf16>,
    return
  }
  func.func @transform_0(%arg0: i32) -> (i32, i32) {
    %c0_i32 = arith.constant 0 : i32
    %c0_i32_0 = arith.constant 0 : i32
    return %arg0, %c0_i32 : i32, i32
  }
  func.func @transform_1(%arg0: i32) -> (i32, i32) {
    %c0_i32 = arith.constant 0 : i32
    %c0_i32_0 = arith.constant 0 : i32
    %c0_i32_1 = arith.constant 0 : i32
    return %c0_i32, %c0_i32_0 : i32, i32
  }
  func.func @transform_2(%arg0: i32) -> (i32, i32) {
    %c0_i32 = arith.constant 0 : i32
    %c0_i32_0 = arith.constant 0 : i32
    %c0_i32_1 = arith.constant 0 : i32
    return %c0_i32, %c0_i32_0 : i32, i32
  }
  func.func @transform_3(%arg0: i32) -> (i32, i32) {
    %c0_i32 = arith.constant 0 : i32
    %c0_i32_0 = arith.constant 0 : i32
    return %arg0, %c0_i32 : i32, i32
  }
}

</mosaic_0001>

<bundles_post_ra>
// kernel: tpu_custom_call.1
= control target key start
LH: loop header
LB: loop body
LE: loop exit
PB: predicated region body
PF: predicated region fallthrough
CT: control target
= control target key end

     0   :  { %8 = vsyncpa [#allocation3], 0  ;;  %s6726_s0 = inlined_call_operand.hbm [shape: bf16[2048,128], index: 0, kind: input, shape index: {}, may-alias: {0,3}]   ;;  %s6727_s1 = inlined_call_operand.vmem [shape: bf16[128,64], index: 1, kind: input, shape index: {}]   ;;  %s6728_s2 = inlined_call_operand.vmem [shape: bf16[64,128], index: 2, kind: input, shape index: {}]   ;;  %s6729_s3 = inlined_call_operand.hbm [shape: bf16[2048,128], index: 3, kind: output, shape index: {}, may-alias: {0,3}]  }
   0x1   :  { %10 = vsyncpa [#allocation3 + $0x1], 0 }
   0x2   :  { %11 = vsyncpa [#allocation4], 0 }
   0x3   :  { %13 = vsyncpa [#allocation4 + $0x1], 0  ;;  %s6259_s12 = smov 0   ;;  %s6261_s13 = smov 0  }
   0x4   :  { %s6263_s14 = smov 0   ;;  %s6265_s15 = smov 0  }
   0x5 LB: > { %s6280_s16 = sadd.s32 4294967295, %s6231_s15   ;;  %s4026_s17 = sadd.s32 4294967294, %s6231_s15   ;;  %s6231_s15 = sphi %s6265_s15, %s6742_s15   ;;  %s6227_s14 = sphi %s6263_s14, %s6741_s14   ;;  %s6223_s13 = sphi %s6261_s13, %s6740_s13   ;;  %s6219_s12 = sphi %s6259_s12, %s6739_s12  }
   0x6   : > { %s6284_s18 = sadd.s32 1, %s6231_s15   ;;  %s26_s19 = sadd.s32 1, %s6227_s14 }
   0x7   : > { %s23_s20 = ssub.s32 %s6231_s15, %s6284_s18  ;;  %p33_p0 = scmp.ne.s32.totalorder %s6227_s14, %s6223_s13 }
   0x8   : > { %p24_p1 = scmp.eq.s32.totalorder %s23_s20, 0  ;;  %p34_p2 = scmp.eq.s32.totalorder %s6231_s15, 0 }
   0x9   : > { %p39_p3 = scmp.ne.s32.totalorder %s6223_s13, %s6219_s12  ;;  %p40_p4 = scmp.eq.s32.totalorder %s6280_s16, 0 }
   0xa   : > { %s6296_s21 = scalar_select %p24_p1, %s6227_s14, %s26_s19  }
   0xb   : > { %p6298_p5 = por %p34_p2, %p33_p0  ;;  %p6302_p6 = por %p40_p4, %p39_p3 }
   0xc   : > { %p105_p7 = scmp.eq.s32.totalorder %s6280_s16, 1  ;;  %p111_p8 = scmp.eq.s32.totalorder %s4026_s17, 1 }
   0xd   : > { %p5381_p10 = scmp.lt.s32.totalorder %s6231_s15, 2  ;;  %s137_s26 = sand.u32 1, %s6227_s14  }
   0xe   : > { %p6309_p11 = por %p105_p7, %p33_p0  ;;  %p6313_p12 = por %p111_p8, %p39_p3 }
   0xf   : > { %s4436_s27 = sshll.u32 %s6231_s15, 13  ;;  %s4029_s28 = sshll.u32 %s137_s26, 9 }
  0x10   : > { %s6733_s24 = scalar_select %p6309_p11, 1, 0 }
  0x11   : > { %s6734_s25 = scalar_select %p6313_p12, 1, 0 }
  0x12   : > { %s6322_s4 = scalar_lea.hbm %s6726_s0, %s4436_s27  ;;  %s141_s5 = scalar_lea.vmem [#allocation2], %s4029_s28 }
  0x13   : > { %s148_s6 = sshll.u32 %s141_s5, 4  ;;  %p6326_p13 = pnand %p5381_p10, %p6298_p5  ;;  %s6330_s6 = int_to_ptr.vmem [resolvable:$true] %s148_s6 }
  0x14   : > { %s6332_s8 = scalar_lea.sflag [#allocation3], %s137_s26  ;;  %s6135_s9 = scalar_lea.hbm %s6322_s4, 8192 }
  0x15   : > { %p6136_p0 = scmp.ne.s32.totalorder %s6322_s4, %s6135_s9  ;;  %p6137_p1 = pneg %p6326_p13 }
  0x16   : > { %s6140_s17 = scalar_lea.hbm %s6726_s0, 16384  ;;  %p6141_p4 = scmp.lt.u32.totalorder %s6322_s4, %s6726_s0 }
  0x17   : > { %p6138_p2 = pnand %p6137_p1, %p6136_p0  ;;  %p6142_p5 = scmp.lt.u32.totalorder %s6140_s17, %s6135_s9 }
  0x18   : > { %p6144_p8 = scmp.lt.u32.totalorder %s6135_s9, %s6322_s4 }
  0x19   : > { %p6139_p3 = pneg %p6138_p2  ;;  %p6143_p7 = por %p6142_p5, %p6141_p4 }
  0x1b   : > { %p6145_p10 = por %p6144_p8, %p6143_p7 }
  0x1d   : > { %p6146_p9 = pnand %p6145_p10, %p6139_p3 }
  0x1f   : > { %6149 = shalt.err (!%p6146_p9)
}
  0x20   : > { %s6150_s22 = scalar_lea.vmem %s6330_s6, 8192  ;;  %s6233_s26 = smov [#allocation2]  }
  0x21   : > { %p6151_p0 = scmp.ne.s32.totalorder %s6330_s6, %s6150_s22  ;;  %s6155_s27 = sshll.u32 %s6233_s26, 4  ;;  %s6156_s27 = int_to_ptr.vmem [resolvable:$false] %s6155_s27 }
  0x22   : > { %s6157_s28 = scalar_lea.vmem %s6156_s27, 16384  ;;  %p6158_p11 = scmp.lt.s32.totalorder %s6330_s6, %s6156_s27 }
  0x23   : > { %p6153_p2 = pnand %p6151_p0, %p6137_p1  ;;  %p6159_p4 = scmp.lt.s32.totalorder %s6157_s28, %s6150_s22 }
  0x25   : > { %p6154_p12 = pneg %p6153_p2  ;;  %p6160_p5 = por %p6159_p4, %p6158_p11 }
  0x27   : > { %p6161_p7 = pnand %p6160_p5, %p6154_p12 }
  0x29   : > { %6164 = shalt.err (!%p6161_p7)
}
  0x2a   : > { %s6234_s29 = smov 64   ;;  %s6235_s30 = smov 4  }
  0x2b   : > { %5376 = dma.hbm_to_vmem [thread:$0]  (!%p6326_p13), %s6322_s4, 8192, %s6330_s6, %s6332_s8, %s6234_s29, %s6234_s29, %s6235_s30  }
  0x2c   : > { %p4032_p9 = scmp.ge.s32.totalorder %s6231_s15, 1  ;;  %p156_p1 = scmp.lt.s32.totalorder %s6231_s15, 3 }
  0x2e   : > { %p157_p3 = pnand %p4032_p9, %p156_p1 }
  0x2f   : > { %s6363_s5 = sand.u32 (!%p157_p3), 1, %s6223_s13  }
  0x30   : > { %160 = sbr.rel (%p157_p3) target bundleno = 824 (0x338), region = 32  ;;  %s4033_s9 = sshll.u32 (!%p157_p3), %s6363_s5, 9 }
  0x31   : > { %s163_s10 = scalar_lea.sflag (!%p157_p3), [#allocation3], %s6363_s5  ;;  %s6369_s11 = scalar_lea.vmem (!%p157_p3), [#allocation2], %s4033_s9 }
  0x37   : > { %6210 = dma.done.wait (%p6302_p6), %s163_s10, 8192  }
  0x38   : > { %6212 = vsyncadd (%p6302_p6), %s163_s10, 4294959104  ;;  %v5419_v0 = vld [vmem:[%s6727_s1] sm:$0xff]   ;;  %v5420_v1 = vld [vmem:[%s6727_s1 + $0x8] sm:$0xff]   ;;  %vm1537_vm0 = vcmask 523264   ;;  %s6547_s26 = scalar_lea.vmem [#allocation5], %s4033_s9  ;;  %s4565_s9 = sshll.u32 %s6280_s16, 13 }
  0x39   : > { %5089 = vmatprep.subr.bf16.mxu0 %v5419_v0  ;;  %v5421_v2 = vld [vmem:[%s6727_s1 + $0x10] sm:$0xff]   ;;  %v5422_v3 = vld [vmem:[%s6727_s1 + $0x18] sm:$0xff]   ;;  %v192_v4 = vld [vmem:[%s6369_s11] sm:$0xff]   ;;  %s6679_s29 = scalar_lea.hbm %s6729_s3, %s4565_s9  ;;  %s3940_s30 = scalar_lea.sflag [#allocation4], %s6363_s5 }
  0x3a   : > { %5090 = vmatpush3.bf16.msra.mxu0 %v5419_v0  ;;  %5105 = vmatprep.mubr.bf16.mxu0 %v192_v4  ;;  %v5423_v5 = vld [vmem:[%s6727_s1 + $0x20] sm:$0xff]   ;;  %v5424_v6 = vld [vmem:[%s6727_s1 + $0x28] sm:$0xff]   ;;  %v5425_v7 = vld [vmem:[%s6727_s1 + $0x30] sm:$0xff]   ;;  %p6736_p11 = scmp.ne.s32.totalorder %s6733_s24, 0  ;;  %s6236_s16 = smov [#allocation5]  }
  0x3b   : > { %5091 = vmatprep.subr.bf16.mxu0 %v5420_v1  ;;  %v5426_v8 = vld [vmem:[%s6727_s1 + $0x38] sm:$0xff]   ;;  %v194_v9 = vld [vmem:[%s6369_s11 + $0x8] sm:$0xff]   ;;  %v196_v10 = vld [vmem:[%s6369_s11 + $0x10] sm:$0xff]   ;;  %s6169_s4 = sshll.u32 %s6236_s16, 4  ;;  %s6170_s4 = int_to_ptr.vmem [resolvable:$false] %s6169_s4 }
  0x3c   : > { %v198_v11 = vld [vmem:[%s6369_s11 + $0x18] sm:$0xff]   ;;  %v200_v12 = vld [vmem:[%s6369_s11 + $0x20] sm:$0xff]   ;;  %v202_v13 = vld [vmem:[%s6369_s11 + $0x28] sm:$0xff]   ;;  %s6171_s6 = scalar_lea.vmem %s6170_s4, 16384 }
  0x3d   : > { %v204_v14 = vld [vmem:[%s6369_s11 + $0x30] sm:$0xff]   ;;  %v206_v15 = vld [vmem:[%s6369_s11 + $0x38] sm:$0xff]   ;;  %v208_v16 = vld [vmem:[%s6369_s11 + $0x40] sm:$0xff]  }
  0x3e   : > { %5092 = vmatpush3.bf16.msra.mxu0 %v5420_v1  ;;  %v210_v17 = vld [vmem:[%s6369_s11 + $0x48] sm:$0xff]   ;;  %v212_v18 = vld [vmem:[%s6369_s11 + $0x50] sm:$0xff]   ;;  %v214_v19 = vld [vmem:[%s6369_s11 + $0x58] sm:$0xff]  }
  0x3f   : > { %5093 = vmatprep.subr.bf16.mxu0 %v5421_v2  ;;  %v216_v20 = vld [vmem:[%s6369_s11 + $0x60] sm:$0xff]   ;;  %v218_v21 = vld [vmem:[%s6369_s11 + $0x68] sm:$0xff]   ;;  %v220_v22 = vld [vmem:[%s6369_s11 + $0x70] sm:$0xff]  }
  0x40   : > { %v222_v23 = vld [vmem:[%s6369_s11 + $0x78] sm:$0xff]   ;;  %v224_v24 = vld [vmem:[%s6369_s11 + $0x80] sm:$0xff]   ;;  %v226_v25 = vld [vmem:[%s6369_s11 + $0x88] sm:$0xff]  }
  0x41   : > { %v228_v26 = vld [vmem:[%s6369_s11 + $0x90] sm:$0xff]   ;;  %v230_v27 = vld [vmem:[%s6369_s11 + $0x98] sm:$0xff]   ;;  %v232_v28 = vld [vmem:[%s6369_s11 + $0xa0] sm:$0xff]  }
  0x42   : > { %5094 = vmatpush3.bf16.msra.mxu0 %v5421_v2  ;;  %v5479_v29 = vld [vmem:[%s6728_s2] sm:$0xff]   ;;  %v234_v30 = vld [vmem:[%s6369_s11 + $0xa8] sm:$0xff]   ;;  %v236_v31 = vld [vmem:[%s6369_s11 + $0xb0] sm:$0xff]  }
  0x43   : > { %5095 = vmatprep.subr.bf16.mxu0 %v5422_v3  ;;  %5233 = vmatprep.subr.bf16.mxu1 %v5479_v29  ;;  %v5482_v32 = vld [vmem:[%s6728_s2 + $0x8] sm:$0xff]   ;;  %v238_v33 = vld [vmem:[%s6369_s11 + $0xb8] sm:$0xff]   ;;  %v240_v34 = vld [vmem:[%s6369_s11 + $0xc0] sm:$0xff]  }
  0x44   : > { %5234 = vmatpush3.bf16.msra.mxu1 %v5479_v29  ;;  %v5483_v35 = vld [vmem:[%s6728_s2 + $0x10] sm:$0xff]   ;;  %v5486_v36 = vld [vmem:[%s6728_s2 + $0x18] sm:$0xff]   ;;  %v242_v37 = vld [vmem:[%s6369_s11 + $0xc8] sm:$0xff]  }
  0x45   : > { %5235 = vmatprep.subr.bf16.mxu1 %v5482_v32  ;;  %v244_v38 = vld [vmem:[%s6369_s11 + $0xd0] sm:$0xff]   ;;  %v246_v39 = vld [vmem:[%s6369_s11 + $0xd8] sm:$0xff]   ;;  %v248_v40 = vld [vmem:[%s6369_s11 + $0xe0] sm:$0xff]  }
  0x46   : > { %5096 = vmatpush3.bf16.msra.mxu0 %v5422_v3  ;;  %v250_v41 = vld [vmem:[%s6369_s11 + $0xe8] sm:$0xff]   ;;  %v252_v42 = vld [vmem:[%s6369_s11 + $0xf0] sm:$0xff]   ;;  %v254_v43 = vld [vmem:[%s6369_s11 + $0xf8] sm:$0xff]  }
  0x47   : > { %5097 = vmatprep.subr.bf16.mxu0 %v5423_v5  ;;  %v256_v44 = vld [vmem:[%s6369_s11 + $0x100] sm:$0xff]   ;;  %v258_v45 = vld [vmem:[%s6369_s11 + $0x108] sm:$0xff]   ;;  %v260_v46 = vld [vmem:[%s6369_s11 + $0x110] sm:$0xff]  }
  0x48   : > { %5236 = vmatpush3.bf16.msra.mxu1 %v5482_v32  ;;  %v262_v47 = vld [vmem:[%s6369_s11 + $0x118] sm:$0xff]   ;;  %v264_v48 = vld [vmem:[%s6369_s11 + $0x120] sm:$0xff]   ;;  %v266_v49 = vld [vmem:[%s6369_s11 + $0x128] sm:$0xff]  }
  0x49   : > { %5237 = vmatprep.subr.bf16.mxu1 %v5483_v35  ;;  %v268_v50 = vld [vmem:[%s6369_s11 + $0x130] sm:$0xff]   ;;  %v270_v51 = vld [vmem:[%s6369_s11 + $0x138] sm:$0xff]   ;;  %v272_v52 = vld [vmem:[%s6369_s11 + $0x140] sm:$0xff]  }
  0x4a   : > { %5098 = vmatpush3.bf16.msra.mxu0 %v5423_v5  ;;  %v274_v53 = vld [vmem:[%s6369_s11 + $0x148] sm:$0xff]   ;;  %v276_v54 = vld [vmem:[%s6369_s11 + $0x150] sm:$0xff]   ;;  %v278_v55 = vld [vmem:[%s6369_s11 + $0x158] sm:$0xff]  }
  0x4b   : > { %5099 = vmatprep.subr.bf16.mxu0 %v5424_v6  ;;  %v280_v56 = vld [vmem:[%s6369_s11 + $0x160] sm:$0xff]   ;;  %v282_v57 = vld [vmem:[%s6369_s11 + $0x168] sm:$0xff]   ;;  %v284_v58 = vld [vmem:[%s6369_s11 + $0x170] sm:$0xff]  }
  0x4c   : > { %5238 = vmatpush3.bf16.msra.mxu1 %v5483_v35  ;;  %v286_v59 = vld [vmem:[%s6369_s11 + $0x178] sm:$0xff]   ;;  %v288_v60 = vld [vmem:[%s6369_s11 + $0x180] sm:$0xff]   ;;  %v290_v61 = vld [vmem:[%s6369_s11 + $0x188] sm:$0xff]  }
  0x4d   : > { %5239 = vmatprep.subr.bf16.mxu1 %v5486_v36  ;;  %v292_v62 = vld [vmem:[%s6369_s11 + $0x190] sm:$0xff]   ;;  %v294_v63 = vld [vmem:[%s6369_s11 + $0x198] sm:$0xff]   ;;  %v296_v0 = vld [vmem:[%s6369_s11 + $0x1a0] sm:$0xff]  }
  0x4e   : > { %5100 = vmatpush3.bf16.msra.mxu0 %v5424_v6  ;;  %v298_v1 = vld [vmem:[%s6369_s11 + $0x1a8] sm:$0xff]   ;;  %v300_v2 = vld [vmem:[%s6369_s11 + $0x1b0] sm:$0xff]   ;;  %v302_v3 = vld [vmem:[%s6369_s11 + $0x1b8] sm:$0xff]  }
  0x4f   : > { %5101 = vmatprep.subr.bf16.mxu0 %v5425_v7  ;;  %v304_v4 = vld [vmem:[%s6369_s11 + $0x1c0] sm:$0xff]  }
  0x50   : > { %5240 = vmatpush3.bf16.msra.mxu1 %v5486_v36 }
  0x52   : > { %5102 = vmatpush3.bf16.msra.mxu0 %v5425_v7 }
  0x53   : > { %5103 = vmatprep.subr.bf16.mxu0 %v5426_v8 }
  0x56   : > { %5104 = vmatpush3.bf16.msra.mxu0 %v5426_v8 }
  0x59   : > { %5106 = vmatmul.mubr.bf16.vlgmr.msra.gmra.mrb[0].mxu0 %v194_v9 }
  0x5a   : > { %5109 = vmatprep.mubr.bf16.mxu0 %v196_v10 }
  0x61   : > { %5110 = vmatmul.mubr.bf16.gmra.mrb[4].mxu0 %v198_v11 }
  0x62   : > { %5113 = vmatprep.mubr.bf16.mxu0 %v200_v12 }
  0x69   : > { %5114 = vmatmul.mubr.bf16.gmra.mrb[8].mxu0 %v202_v13 }
  0x6a   : > { %5117 = vmatprep.mubr.bf16.mxu0 %v204_v14 }
  0x71   : > { %5118 = vmatmul.mubr.bf16.gmra.mrb[12].mxu0 %v206_v15  ;;  %v306_v15 = vld [vmem:[%s6369_s11 + $0x1c8] sm:$0xff]  }
  0x72   : > { %5121 = vmatprep.mubr.bf16.mxu0 %v208_v16  ;;  %v308_v16 = vld [vmem:[%s6369_s11 + $0x1d0] sm:$0xff]  }
  0x79   : > { %5122 = vmatmul.mubr.bf16.gmra.mrb[16].mxu0 %v210_v17 }
  0x7a   : > { %5125 = vmatprep.mubr.bf16.mxu0 %v212_v18 }
  0x81   : > { %5126 = vmatmul.mubr.bf16.gmra.mrb[20].mxu0 %v214_v19 }
  0x82   : > { %5129 = vmatprep.mubr.bf16.mxu0 %v216_v20 }
  0x89   : > { %5130 = vmatmul.mubr.bf16.gmra.mrb[24].mxu0 %v218_v21 }
  0x8a   : > { %5133 = vmatprep.mubr.bf16.mxu0 %v220_v22 }
  0x91   : > { %5134 = vmatmul.mubr.bf16.gmra.mrb[28].mxu0 %v222_v23 }
  0x92   : > { %5137 = vmatprep.mubr.bf16.mxu0 %v224_v24 }
  0x99   : > { %5138 = vmatmul.mubr.bf16.gmra.mrb[32].mxu0 %v226_v25 }
  0x9a   : > { %5141 = vmatprep.mubr.bf16.mxu0 %v228_v26 }
  0xa1   : > { %5142 = vmatmul.mubr.bf16.gmra.mrb[36].mxu0 %v230_v27  ;;  %v310_v27 = vld [vmem:[%s6369_s11 + $0x1d8] sm:$0xff]  }
  0xa2   : > { %5145 = vmatprep.mubr.bf16.mxu0 %v232_v28  ;;  %v312_v28 = vld [vmem:[%s6369_s11 + $0x1e0] sm:$0xff]  }
  0xa9   : > { %5146 = vmatmul.mubr.bf16.gmra.mrb[40].mxu0 %v234_v30 }
  0xaa   : > { %5149 = vmatprep.mubr.bf16.mxu0 %v236_v31 }
  0xb1   : > { %5150 = vmatmul.mubr.bf16.gmra.mrb[44].mxu0 %v238_v33 }
  0xb2   : > { %5153 = vmatprep.mubr.bf16.mxu0 %v240_v34 }
  0xb9   : > { %5154 = vmatmul.mubr.bf16.gmra.mrb[48].mxu0 %v242_v37 }
  0xba   : > { %5157 = vmatprep.mubr.bf16.mxu0 %v244_v38 }
  0xc1   : > { %5158 = vmatmul.mubr.bf16.gmra.mrb[52].mxu0 %v246_v39  ;;  %v314_v39 = vld [vmem:[%s6369_s11 + $0x1e8] sm:$0xff]  }
  0xc2   : > { %5161 = vmatprep.mubr.bf16.mxu0 %v248_v40  ;;  %v316_v40 = vld [vmem:[%s6369_s11 + $0x1f0] sm:$0xff]  }
  0xc9   : > { %5162 = vmatmul.mubr.bf16.gmra.mrb[56].mxu0 %v250_v41 }
  0xca   : > { %5165 = vmatprep.mubr.bf16.mxu0 %v252_v42 }
  0xd1   : > { %5166 = vmatmul.mubr.bf16.gmra.mrb[60].mxu0 %v254_v43 }
  0xd2   : > { %5169 = vmatprep.mubr.bf16.mxu0 %v256_v44 }
  0xd9   : > { %5170 = vmatmul.mubr.bf16.gmra.mrb[64].mxu0 %v258_v45 }
  0xda   : > { %5173 = vmatprep.mubr.bf16.mxu0 %v260_v46 }
  0xe1   : > { %5174 = vmatmul.mubr.bf16.gmra.mrb[68].mxu0 %v262_v47 }
  0xe2   : > { %5177 = vmatprep.mubr.bf16.mxu0 %v264_v48 }
  0xe9   : > { %5178 = vmatmul.mubr.bf16.gmra.mrb[72].mxu0 %v266_v49 }
  0xea   : > { %5181 = vmatprep.mubr.bf16.mxu0 %v268_v50 }
  0xf1   : > { %5182 = vmatmul.mubr.bf16.gmra.mrb[76].mxu0 %v270_v51  ;;  %v318_v51 = vld [vmem:[%s6369_s11 + $0x1f8] sm:$0xff]  }
  0xf2   : > { %5185 = vmatprep.mubr.bf16.mxu0 %v272_v52 }
  0xf9   : > { %5186 = vmatmul.mubr.bf16.gmra.mrb[80].mxu0 %v274_v53 }
  0xfa   : > { %5189 = vmatprep.mubr.bf16.mxu0 %v276_v54 }
 0x101   : > { %5190 = vmatmul.mubr.bf16.gmra.mrb[84].mxu0 %v278_v55 }
 0x102   : > { %5193 = vmatprep.mubr.bf16.mxu0 %v280_v56 }
 0x109   : > { %5194 = vmatmul.mubr.bf16.gmra.mrb[88].mxu0 %v282_v57 }
 0x10a   : > { %5197 = vmatprep.mubr.bf16.mxu0 %v284_v58 }
 0x111   : > { %5198 = vmatmul.mubr.bf16.gmra.mrb[92].mxu0 %v286_v59 }
 0x112   : > { %5201 = vmatprep.mubr.bf16.mxu0 %v288_v60 }
 0x119   : > { %5202 = vmatmul.mubr.bf16.gmra.mrb[96].mxu0 %v290_v61 }
 0x11a   : > { %5205 = vmatprep.mubr.bf16.mxu0 %v292_v62 }
 0x121   : > { %5206 = vmatmul.mubr.bf16.gmra.mrb[100].mxu0 %v294_v63 }
 0x122   : > { %5209 = vmatprep.mubr.bf16.mxu0 %v296_v0 }
 0x129   : > { %5210 = vmatmul.mubr.bf16.gmra.mrb[104].mxu0 %v298_v1 }
 0x12a   : > { %5213 = vmatprep.mubr.bf16.mxu0 %v300_v2 }
 0x12c   : > { %v5107_v5 = vpop.f32.mrb[0].mxu0 }
 0x12d   : > { %v802_v6 = vpop.f32.mrb[1].mxu0  ;;  %v1315_v8 = vmax.f32 %v5107_v5, 0.0 }
 0x12e   : > { %v5108_v7 = vpop.f32.mrb[2].mxu0  ;;  %v1313_v11 = vmax.f32 %v802_v6, 0.0 }
 0x12f   : > { %v1316_v9 = vmax.f32 %v5108_v7, 0.0  ;;  %v805_v10 = vpop.f32.mrb[3].mxu0 }
 0x130   : > { %v1314_v12 = vmax.f32 %v805_v10, 0.0 }
 0x131   : > { %v1442_v13 = vpack.c.bf16 %v1316_v9, %v1315_v8  ;;  %5214 = vmatmul.mubr.bf16.gmra.mrb[108].mxu0 %v302_v3 }
 0x132   : > { %v1441_v14 = vpack.c.bf16 %v1314_v12, %v1313_v11  ;;  %5217 = vmatprep.mubr.bf16.mxu0 %v304_v4 }
 0x134   : > { %v5111_v17 = vpop.f32.mrb[4].mxu0  ;;  %5241 = vmatprep.mubr.msk.bf16.mxu1 %vm1537_vm0, %v1441_v14 }
 0x135   : > { %v818_v18 = vpop.f32.mrb[5].mxu0  ;;  %5242 = vmatmul.mubr.msk.bf16.vlgmr.msra.gmra.mrb[0].mxu1 %vm1537_vm0, %v1442_v13  ;;  %v1319_v20 = vmax.f32 %v5111_v17, 0.0 }
 0x136   : > { %v5112_v19 = vpop.f32.mrb[6].mxu0  ;;  %v1317_v23 = vmax.f32 %v818_v18, 0.0 }
 0x137   : > { %v1320_v21 = vmax.f32 %v5112_v19, 0.0  ;;  %v821_v22 = vpop.f32.mrb[7].mxu0 }
 0x138   : > { %v1318_v24 = vmax.f32 %v821_v22, 0.0 }
 0x139   : > { %v1444_v25 = vpack.c.bf16 %v1320_v21, %v1319_v20  ;;  %5218 = vmatmul.mubr.bf16.gmra.mrb[112].mxu0 %v306_v15 }
 0x13a   : > { %v1443_v26 = vpack.c.bf16 %v1318_v24, %v1317_v23  ;;  %5221 = vmatprep.mubr.bf16.mxu0 %v308_v16 }
 0x13c   : > { %v5115_v29 = vpop.f32.mrb[8].mxu0  ;;  %5245 = vmatprep.mubr.msk.bf16.mxu1 %vm1537_vm0, %v1443_v26 }
 0x13d   : > { %v834_v30 = vpop.f32.mrb[9].mxu0  ;;  %5246 = vmatmul.mubr.msk.bf16.gmra.mrb[4].mxu1 %vm1537_vm0, %v1444_v25  ;;  %v1323_v32 = vmax.f32 %v5115_v29, 0.0 }
 0x13e   : > { %v5116_v31 = vpop.f32.mrb[10].mxu0  ;;  %v1321_v35 = vmax.f32 %v834_v30, 0.0 }
 0x13f   : > { %v1324_v33 = vmax.f32 %v5116_v31, 0.0  ;;  %v837_v34 = vpop.f32.mrb[11].mxu0 }
 0x140   : > { %v1322_v36 = vmax.f32 %v837_v34, 0.0 }
 0x141   : > { %v1446_v37 = vpack.c.bf16 %v1324_v33, %v1323_v32  ;;  %5222 = vmatmul.mubr.bf16.gmra.mrb[116].mxu0 %v310_v27 }
 0x142   : > { %v1445_v38 = vpack.c.bf16 %v1322_v36, %v1321_v35  ;;  %5225 = vmatprep.mubr.bf16.mxu0 %v312_v28 }
 0x144   : > { %v5119_v41 = vpop.f32.mrb[12].mxu0  ;;  %5249 = vmatprep.mubr.msk.bf16.mxu1 %vm1537_vm0, %v1445_v38 }
 0x145   : > { %v850_v42 = vpop.f32.mrb[13].mxu0  ;;  %5250 = vmatmul.mubr.msk.bf16.gmra.mrb[8].mxu1 %vm1537_vm0, %v1446_v37  ;;  %v1327_v44 = vmax.f32 %v5119_v41, 0.0 }
 0x146   : > { %v5120_v43 = vpop.f32.mrb[14].mxu0  ;;  %v1325_v47 = vmax.f32 %v850_v42, 0.0 }
 0x147   : > { %v1328_v45 = vmax.f32 %v5120_v43, 0.0  ;;  %v853_v46 = vpop.f32.mrb[15].mxu0 }
 0x148   : > { %v1326_v48 = vmax.f32 %v853_v46, 0.0 }
 0x149   : > { %v1448_v49 = vpack.c.bf16 %v1328_v45, %v1327_v44  ;;  %5226 = vmatmul.mubr.bf16.gmra.mrb[120].mxu0 %v314_v39 }
 0x14a   : > { %v1447_v50 = vpack.c.bf16 %v1326_v48, %v1325_v47  ;;  %5229 = vmatprep.mubr.bf16.mxu0 %v316_v40 }
 0x14c   : > { %v5123_v52 = vpop.f32.mrb[16].mxu0  ;;  %5253 = vmatprep.mubr.msk.bf16.mxu1 %vm1537_vm0, %v1447_v50 }
 0x14d   : > { %v866_v53 = vpop.f32.mrb[17].mxu0  ;;  %5254 = vmatmul.mubr.msk.bf16.gmra.mrb[12].mxu1 %vm1537_vm0, %v1448_v49  ;;  %v1331_v55 = vmax.f32 %v5123_v52, 0.0 }
 0x14e   : > { %v5124_v54 = vpop.f32.mrb[18].mxu0  ;;  %v1329_v58 = vmax.f32 %v866_v53, 0.0 }
 0x14f   : > { %v1332_v56 = vmax.f32 %v5124_v54, 0.0  ;;  %v869_v57 = vpop.f32.mrb[19].mxu0 }
 0x150   : > { %v1330_v59 = vmax.f32 %v869_v57, 0.0 }
 0x151   : > { %v1450_v60 = vpack.c.bf16 %v1332_v56, %v1331_v55  ;;  %5230 = vmatmul.mubr.bf16.gmra.mrb[124].mxu0 %v318_v51 }
 0x152   : > { %v1449_v61 = vpack.c.bf16 %v1330_v59, %v1329_v58 }
 0x154   : > { %v5127_v62 = vpop.f32.mrb[20].mxu0  ;;  %5257 = vmatprep.mubr.msk.bf16.mxu1 %vm1537_vm0, %v1449_v61 }
 0x155   : > { %v882_v63 = vpop.f32.mrb[21].mxu0  ;;  %5258 = vmatmul.mubr.msk.bf16.gmra.mrb[16].mxu1 %vm1537_vm0, %v1450_v60  ;;  %v1335_v1 = vmax.f32 %v5127_v62, 0.0 }
 0x156   : > { %v5128_v0 = vpop.f32.mrb[22].mxu0  ;;  %v1333_v4 = vmax.f32 %v882_v63, 0.0 }
 0x157   : > { %v1336_v2 = vmax.f32 %v5128_v0, 0.0  ;;  %v885_v3 = vpop.f32.mrb[23].mxu0 }
 0x158   : > { %v1334_v5 = vmax.f32 %v885_v3, 0.0 }
 0x159   : > { %v1452_v6 = vpack.c.bf16 %v1336_v2, %v1335_v1 }
 0x15a   : > { %v1451_v7 = vpack.c.bf16 %v1334_v5, %v1333_v4 }
 0x15c   : > { %v5131_v8 = vpop.f32.mrb[24].mxu0  ;;  %5261 = vmatprep.mubr.msk.bf16.mxu1 %vm1537_vm0, %v1451_v7 }
 0x15d   : > { %v898_v9 = vpop.f32.mrb[25].mxu0  ;;  %5262 = vmatmul.mubr.msk.bf16.gmra.mrb[20].mxu1 %vm1537_vm0, %v1452_v6  ;;  %v1339_v11 = vmax.f32 %v5131_v8, 0.0 }
 0x15e   : > { %v5132_v10 = vpop.f32.mrb[26].mxu0  ;;  %v1337_v14 = vmax.f32 %v898_v9, 0.0 }
 0x15f   : > { %v1340_v12 = vmax.f32 %v5132_v10, 0.0  ;;  %v901_v13 = vpop.f32.mrb[27].mxu0 }
 0x160   : > { %v1338_v15 = vmax.f32 %v901_v13, 0.0 }
 0x161   : > { %v1454_v16 = vpack.c.bf16 %v1340_v12, %v1339_v11 }
 0x162   : > { %v1453_v17 = vpack.c.bf16 %v1338_v15, %v1337_v14 }
 0x164   : > { %v5135_v18 = vpop.f32.mrb[28].mxu0  ;;  %5265 = vmatprep.mubr.msk.bf16.mxu1 %vm1537_vm0, %v1453_v17 }
 0x165   : > { %v914_v19 = vpop.f32.mrb[29].mxu0  ;;  %5266 = vmatmul.mubr.msk.bf16.gmra.mrb[24].mxu1 %vm1537_vm0, %v1454_v16  ;;  %v1343_v21 = vmax.f32 %v5135_v18, 0.0 }
 0x166   : > { %v5136_v20 = vpop.f32.mrb[30].mxu0  ;;  %v1341_v24 = vmax.f32 %v914_v19, 0.0 }
 0x167   : > { %v1344_v22 = vmax.f32 %v5136_v20, 0.0  ;;  %v917_v23 = vpop.f32.mrb[31].mxu0 }
 0x168   : > { %v1342_v25 = vmax.f32 %v917_v23, 0.0 }
 0x169   : > { %v1456_v26 = vpack.c.bf16 %v1344_v22, %v1343_v21 }
 0x16a   : > { %v1455_v27 = vpack.c.bf16 %v1342_v25, %v1341_v24 }
 0x16c   : > { %v5139_v28 = vpop.f32.mrb[32].mxu0  ;;  %5269 = vmatprep.mubr.msk.bf16.mxu1 %vm1537_vm0, %v1455_v27 }
 0x16d   : > { %v930_v29 = vpop.f32.mrb[33].mxu0  ;;  %5270 = vmatmul.mubr.msk.bf16.gmra.mrb[28].mxu1 %vm1537_vm0, %v1456_v26  ;;  %v1347_v31 = vmax.f32 %v5139_v28, 0.0 }
 0x16e   : > { %v5140_v30 = vpop.f32.mrb[34].mxu0  ;;  %v1345_v34 = vmax.f32 %v930_v29, 0.0 }
 0x16f   : > { %v1348_v32 = vmax.f32 %v5140_v30, 0.0  ;;  %v933_v33 = vpop.f32.mrb[35].mxu0 }
 0x170   : > { %v1346_v35 = vmax.f32 %v933_v33, 0.0 }
 0x171   : > { %v1458_v36 = vpack.c.bf16 %v1348_v32, %v1347_v31 }
 0x172   : > { %v1457_v37 = vpack.c.bf16 %v1346_v35, %v1345_v34 }
 0x174   : > { %v5143_v38 = vpop.f32.mrb[36].mxu0  ;;  %5273 = vmatprep.mubr.msk.bf16.mxu1 %vm1537_vm0, %v1457_v37 }
 0x175   : > { %v946_v39 = vpop.f32.mrb[37].mxu0  ;;  %5274 = vmatmul.mubr.msk.bf16.gmra.mrb[32].mxu1 %vm1537_vm0, %v1458_v36  ;;  %v1351_v41 = vmax.f32 %v5143_v38, 0.0 }
 0x176   : > { %v5144_v40 = vpop.f32.mrb[38].mxu0  ;;  %v1349_v44 = vmax.f32 %v946_v39, 0.0 }
 0x177   : > { %v1352_v42 = vmax.f32 %v5144_v40, 0.0  ;;  %v949_v43 = vpop.f32.mrb[39].mxu0 }
 0x178   : > { %v1350_v45 = vmax.f32 %v949_v43, 0.0 }
 0x179   : > { %v1460_v46 = vpack.c.bf16 %v1352_v42, %v1351_v41 }
 0x17a   : > { %v1459_v47 = vpack.c.bf16 %v1350_v45, %v1349_v44 }
 0x17c   : > { %v5147_v48 = vpop.f32.mrb[40].mxu0  ;;  %5277 = vmatprep.mubr.msk.bf16.mxu1 %vm1537_vm0, %v1459_v47 }
 0x17d   : > { %v962_v49 = vpop.f32.mrb[41].mxu0  ;;  %5278 = vmatmul.mubr.msk.bf16.gmra.mrb[36].mxu1 %vm1537_vm0, %v1460_v46  ;;  %v1355_v51 = vmax.f32 %v5147_v48, 0.0 }
 0x17e   : > { %v5148_v50 = vpop.f32.mrb[42].mxu0  ;;  %v1353_v54 = vmax.f32 %v962_v49, 0.0 }
 0x17f   : > { %v1356_v52 = vmax.f32 %v5148_v50, 0.0  ;;  %v965_v53 = vpop.f32.mrb[43].mxu0 }
 0x180   : > { %v1354_v55 = vmax.f32 %v965_v53, 0.0 }
 0x181   : > { %v1462_v56 = vpack.c.bf16 %v1356_v52, %v1355_v51 }
 0x182   : > { %v1461_v57 = vpack.c.bf16 %v1354_v55, %v1353_v54 }
 0x184   : > { %v5151_v58 = vpop.f32.mrb[44].mxu0  ;;  %5281 = vmatprep.mubr.msk.bf16.mxu1 %vm1537_vm0, %v1461_v57 }
 0x185   : > { %v978_v59 = vpop.f32.mrb[45].mxu0  ;;  %5282 = vmatmul.mubr.msk.bf16.gmra.mrb[40].mxu1 %vm1537_vm0, %v1462_v56  ;;  %v1359_v61 = vmax.f32 %v5151_v58, 0.0 }
 0x186   : > { %v5152_v60 = vpop.f32.mrb[46].mxu0  ;;  %v1357_v0 = vmax.f32 %v978_v59, 0.0 }
 0x187   : > { %v1360_v62 = vmax.f32 %v5152_v60, 0.0  ;;  %v981_v63 = vpop.f32.mrb[47].mxu0 }
 0x188   : > { %v1358_v1 = vmax.f32 %v981_v63, 0.0 }
 0x189   : > { %v1464_v2 = vpack.c.bf16 %v1360_v62, %v1359_v61 }
 0x18a   : > { %v1463_v3 = vpack.c.bf16 %v1358_v1, %v1357_v0 }
 0x18c   : > { %v5155_v4 = vpop.f32.mrb[48].mxu0  ;;  %5285 = vmatprep.mubr.msk.bf16.mxu1 %vm1537_vm0, %v1463_v3 }
 0x18d   : > { %v994_v5 = vpop.f32.mrb[49].mxu0  ;;  %5286 = vmatmul.mubr.msk.bf16.gmra.mrb[44].mxu1 %vm1537_vm0, %v1464_v2  ;;  %v1363_v7 = vmax.f32 %v5155_v4, 0.0 }
 0x18e   : > { %v5156_v6 = vpop.f32.mrb[50].mxu0  ;;  %v1361_v10 = vmax.f32 %v994_v5, 0.0 }
 0x18f   : > { %v1364_v8 = vmax.f32 %v5156_v6, 0.0  ;;  %v997_v9 = vpop.f32.mrb[51].mxu0 }
 0x190   : > { %v1362_v11 = vmax.f32 %v997_v9, 0.0 }
 0x191   : > { %v1466_v12 = vpack.c.bf16 %v1364_v8, %v1363_v7 }
 0x192   : > { %v1465_v13 = vpack.c.bf16 %v1362_v11, %v1361_v10 }
 0x194   : > { %v5159_v14 = vpop.f32.mrb[52].mxu0  ;;  %5289 = vmatprep.mubr.msk.bf16.mxu1 %vm1537_vm0, %v1465_v13 }
 0x195   : > { %v1010_v15 = vpop.f32.mrb[53].mxu0  ;;  %5290 = vmatmul.mubr.msk.bf16.gmra.mrb[48].mxu1 %vm1537_vm0, %v1466_v12  ;;  %v1367_v17 = vmax.f32 %v5159_v14, 0.0 }
 0x196   : > { %v5160_v16 = vpop.f32.mrb[54].mxu0  ;;  %v1365_v20 = vmax.f32 %v1010_v15, 0.0 }
 0x197   : > { %v1368_v18 = vmax.f32 %v5160_v16, 0.0  ;;  %v1013_v19 = vpop.f32.mrb[55].mxu0 }
 0x198   : > { %v1366_v21 = vmax.f32 %v1013_v19, 0.0 }
 0x199   : > { %v1468_v22 = vpack.c.bf16 %v1368_v18, %v1367_v17 }
 0x19a   : > { %v1467_v23 = vpack.c.bf16 %v1366_v21, %v1365_v20 }
 0x19c   : > { %v5163_v24 = vpop.f32.mrb[56].mxu0  ;;  %5293 = vmatprep.mubr.msk.bf16.mxu1 %vm1537_vm0, %v1467_v23 }
 0x19d   : > { %v1026_v25 = vpop.f32.mrb[57].mxu0  ;;  %5294 = vmatmul.mubr.msk.bf16.gmra.mrb[52].mxu1 %vm1537_vm0, %v1468_v22  ;;  %v1371_v27 = vmax.f32 %v5163_v24, 0.0 }
 0x19e   : > { %v5164_v26 = vpop.f32.mrb[58].mxu0  ;;  %v1369_v30 = vmax.f32 %v1026_v25, 0.0 }
 0x19f   : > { %v1372_v28 = vmax.f32 %v5164_v26, 0.0  ;;  %v1029_v29 = vpop.f32.mrb[59].mxu0 }
 0x1a0   : > { %v1370_v31 = vmax.f32 %v1029_v29, 0.0 }
 0x1a1   : > { %v1470_v32 = vpack.c.bf16 %v1372_v28, %v1371_v27 }
 0x1a2   : > { %v1469_v33 = vpack.c.bf16 %v1370_v31, %v1369_v30 }
 0x1a4   : > { %v5167_v34 = vpop.f32.mrb[60].mxu0  ;;  %5297 = vmatprep.mubr.msk.bf16.mxu1 %vm1537_vm0, %v1469_v33 }
 0x1a5   : > { %v1042_v35 = vpop.f32.mrb[61].mxu0  ;;  %5298 = vmatmul.mubr.msk.bf16.gmra.mrb[56].mxu1 %vm1537_vm0, %v1470_v32  ;;  %v1375_v37 = vmax.f32 %v5167_v34, 0.0 }
 0x1a6   : > { %v5168_v36 = vpop.f32.mrb[62].mxu0  ;;  %v1373_v40 = vmax.f32 %v1042_v35, 0.0 }
 0x1a7   : > { %v1376_v38 = vmax.f32 %v5168_v36, 0.0  ;;  %v1045_v39 = vpop.f32.mrb[63].mxu0 }
 0x1a8   : > { %v1374_v41 = vmax.f32 %v1045_v39, 0.0 }
 0x1a9   : > { %v1472_v42 = vpack.c.bf16 %v1376_v38, %v1375_v37 }
 0x1aa   : > { %v1471_v43 = vpack.c.bf16 %v1374_v41, %v1373_v40 }
 0x1ac   : > { %v5171_v44 = vpop.f32.mrb[64].mxu0  ;;  %5301 = vmatprep.mubr.msk.bf16.mxu1 %vm1537_vm0, %v1471_v43 }
 0x1ad   : > { %v1058_v45 = vpop.f32.mrb[65].mxu0  ;;  %5302 = vmatmul.mubr.msk.bf16.gmra.mrb[60].mxu1 %vm1537_vm0, %v1472_v42  ;;  %v1379_v47 = vmax.f32 %v5171_v44, 0.0 }
 0x1ae   : > { %v5172_v46 = vpop.f32.mrb[66].mxu0  ;;  %v1377_v50 = vmax.f32 %v1058_v45, 0.0 }
 0x1af   : > { %v1380_v48 = vmax.f32 %v5172_v46, 0.0  ;;  %v1061_v49 = vpop.f32.mrb[67].mxu0 }
 0x1b0   : > { %v1378_v51 = vmax.f32 %v1061_v49, 0.0 }
 0x1b1   : > { %v1474_v52 = vpack.c.bf16 %v1380_v48, %v1379_v47 }
 0x1b2   : > { %v1473_v53 = vpack.c.bf16 %v1378_v51, %v1377_v50 }
 0x1b4   : > { %v5175_v54 = vpop.f32.mrb[68].mxu0  ;;  %5305 = vmatprep.mubr.msk.bf16.mxu1 %vm1537_vm0, %v1473_v53 }
 0x1b5   : > { %v1074_v55 = vpop.f32.mrb[69].mxu0  ;;  %5306 = vmatmul.mubr.msk.bf16.gmra.mrb[64].mxu1 %vm1537_vm0, %v1474_v52  ;;  %v1383_v57 = vmax.f32 %v5175_v54, 0.0 }
 0x1b6   : > { %v5176_v56 = vpop.f32.mrb[70].mxu0  ;;  %v1381_v60 = vmax.f32 %v1074_v55, 0.0 }
 0x1b7   : > { %v1384_v58 = vmax.f32 %v5176_v56, 0.0  ;;  %v1077_v59 = vpop.f32.mrb[71].mxu0 }
 0x1b8   : > { %v1382_v61 = vmax.f32 %v1077_v59, 0.0 }
 0x1b9   : > { %v1476_v62 = vpack.c.bf16 %v1384_v58, %v1383_v57 }
 0x1ba   : > { %v1475_v63 = vpack.c.bf16 %v1382_v61, %v1381_v60 }
 0x1bc   : > { %v5179_v0 = vpop.f32.mrb[72].mxu0  ;;  %5309 = vmatprep.mubr.msk.bf16.mxu1 %vm1537_vm0, %v1475_v63 }
 0x1bd   : > { %v1090_v1 = vpop.f32.mrb[73].mxu0  ;;  %5310 = vmatmul.mubr.msk.bf16.gmra.mrb[68].mxu1 %vm1537_vm0, %v1476_v62  ;;  %v1387_v3 = vmax.f32 %v5179_v0, 0.0 }
 0x1be   : > { %v5180_v2 = vpop.f32.mrb[74].mxu0  ;;  %v1385_v6 = vmax.f32 %v1090_v1, 0.0 }
 0x1bf   : > { %v1388_v4 = vmax.f32 %v5180_v2, 0.0  ;;  %v1093_v5 = vpop.f32.mrb[75].mxu0 }
 0x1c0   : > { %v1386_v7 = vmax.f32 %v1093_v5, 0.0 }
 0x1c1   : > { %v1478_v8 = vpack.c.bf16 %v1388_v4, %v1387_v3 }
 0x1c2   : > { %v1477_v9 = vpack.c.bf16 %v1386_v7, %v1385_v6 }
 0x1c4   : > { %v5183_v10 = vpop.f32.mrb[76].mxu0  ;;  %5313 = vmatprep.mubr.msk.bf16.mxu1 %vm1537_vm0, %v1477_v9 }
 0x1c5   : > { %v1106_v11 = vpop.f32.mrb[77].mxu0  ;;  %5314 = vmatmul.mubr.msk.bf16.gmra.mrb[72].mxu1 %vm1537_vm0, %v1478_v8  ;;  %v1391_v13 = vmax.f32 %v5183_v10, 0.0 }
 0x1c6   : > { %v5184_v12 = vpop.f32.mrb[78].mxu0  ;;  %v1389_v16 = vmax.f32 %v1106_v11, 0.0 }
 0x1c7   : > { %v1392_v14 = vmax.f32 %v5184_v12, 0.0  ;;  %v1109_v15 = vpop.f32.mrb[79].mxu0 }
 0x1c8   : > { %v1390_v17 = vmax.f32 %v1109_v15, 0.0 }
 0x1c9   : > { %v1480_v18 = vpack.c.bf16 %v1392_v14, %v1391_v13 }
 0x1ca   : > { %v1479_v19 = vpack.c.bf16 %v1390_v17, %v1389_v16 }
 0x1cc   : > { %v5187_v20 = vpop.f32.mrb[80].mxu0  ;;  %5317 = vmatprep.mubr.msk.bf16.mxu1 %vm1537_vm0, %v1479_v19 }
 0x1cd   : > { %v1122_v21 = vpop.f32.mrb[81].mxu0  ;;  %5318 = vmatmul.mubr.msk.bf16.gmra.mrb[76].mxu1 %vm1537_vm0, %v1480_v18  ;;  %v1395_v23 = vmax.f32 %v5187_v20, 0.0 }
 0x1ce   : > { %v5188_v22 = vpop.f32.mrb[82].mxu0  ;;  %v1393_v26 = vmax.f32 %v1122_v21, 0.0 }
 0x1cf   : > { %v1396_v24 = vmax.f32 %v5188_v22, 0.0  ;;  %v1125_v25 = vpop.f32.mrb[83].mxu0 }
 0x1d0   : > { %v1394_v27 = vmax.f32 %v1125_v25, 0.0 }
 0x1d1   : > { %v1482_v28 = vpack.c.bf16 %v1396_v24, %v1395_v23 }
 0x1d2   : > { %v1481_v29 = vpack.c.bf16 %v1394_v27, %v1393_v26 }
 0x1d4   : > { %v5191_v30 = vpop.f32.mrb[84].mxu0  ;;  %5321 = vmatprep.mubr.msk.bf16.mxu1 %vm1537_vm0, %v1481_v29 }
 0x1d5   : > { %v1138_v31 = vpop.f32.mrb[85].mxu0  ;;  %5322 = vmatmul.mubr.msk.bf16.gmra.mrb[80].mxu1 %vm1537_vm0, %v1482_v28  ;;  %v1399_v33 = vmax.f32 %v5191_v30, 0.0 }
 0x1d6   : > { %v5192_v32 = vpop.f32.mrb[86].mxu0  ;;  %v1397_v36 = vmax.f32 %v1138_v31, 0.0 }
 0x1d7   : > { %v1400_v34 = vmax.f32 %v5192_v32, 0.0  ;;  %v1141_v35 = vpop.f32.mrb[87].mxu0 }
 0x1d8   : > { %v1398_v37 = vmax.f32 %v1141_v35, 0.0 }
 0x1d9   : > { %v1484_v38 = vpack.c.bf16 %v1400_v34, %v1399_v33 }
 0x1da   : > { %v1483_v39 = vpack.c.bf16 %v1398_v37, %v1397_v36 }
 0x1dc   : > { %v5195_v40 = vpop.f32.mrb[88].mxu0  ;;  %5325 = vmatprep.mubr.msk.bf16.mxu1 %vm1537_vm0, %v1483_v39 }
 0x1dd   : > { %v1154_v41 = vpop.f32.mrb[89].mxu0  ;;  %5326 = vmatmul.mubr.msk.bf16.gmra.mrb[84].mxu1 %vm1537_vm0, %v1484_v38  ;;  %v1403_v43 = vmax.f32 %v5195_v40, 0.0 }
 0x1de   : > { %v5196_v42 = vpop.f32.mrb[90].mxu0  ;;  %v1401_v46 = vmax.f32 %v1154_v41, 0.0 }
 0x1df   : > { %v1404_v44 = vmax.f32 %v5196_v42, 0.0  ;;  %v1157_v45 = vpop.f32.mrb[91].mxu0 }
 0x1e0   : > { %v1402_v47 = vmax.f32 %v1157_v45, 0.0 }
 0x1e1   : > { %v1486_v48 = vpack.c.bf16 %v1404_v44, %v1403_v43 }
 0x1e2   : > { %v1485_v49 = vpack.c.bf16 %v1402_v47, %v1401_v46 }
 0x1e4   : > { %v5199_v50 = vpop.f32.mrb[92].mxu0  ;;  %5329 = vmatprep.mubr.msk.bf16.mxu1 %vm1537_vm0, %v1485_v49 }
 0x1e5   : > { %v1170_v51 = vpop.f32.mrb[93].mxu0  ;;  %5330 = vmatmul.mubr.msk.bf16.gmra.mrb[88].mxu1 %vm1537_vm0, %v1486_v48  ;;  %v1407_v53 = vmax.f32 %v5199_v50, 0.0 }
 0x1e6   : > { %v5200_v52 = vpop.f32.mrb[94].mxu0  ;;  %v1405_v56 = vmax.f32 %v1170_v51, 0.0 }
 0x1e7   : > { %v1408_v54 = vmax.f32 %v5200_v52, 0.0  ;;  %v1173_v55 = vpop.f32.mrb[95].mxu0 }
 0x1e8   : > { %v1406_v57 = vmax.f32 %v1173_v55, 0.0 }
 0x1e9   : > { %v1488_v58 = vpack.c.bf16 %v1408_v54, %v1407_v53 }
 0x1ea   : > { %v1487_v59 = vpack.c.bf16 %v1406_v57, %v1405_v56 }
 0x1ec   : > { %v5203_v60 = vpop.f32.mrb[96].mxu0  ;;  %5333 = vmatprep.mubr.msk.bf16.mxu1 %vm1537_vm0, %v1487_v59 }
 0x1ed   : > { %v1186_v61 = vpop.f32.mrb[97].mxu0  ;;  %5334 = vmatmul.mubr.msk.bf16.gmra.mrb[92].mxu1 %vm1537_vm0, %v1488_v58  ;;  %v1411_v63 = vmax.f32 %v5203_v60, 0.0 }
 0x1ee   : > { %v5204_v62 = vpop.f32.mrb[98].mxu0  ;;  %v1409_v2 = vmax.f32 %v1186_v61, 0.0 }
 0x1ef   : > { %v1412_v0 = vmax.f32 %v5204_v62, 0.0  ;;  %v1189_v1 = vpop.f32.mrb[99].mxu0 }
 0x1f0   : > { %v1410_v3 = vmax.f32 %v1189_v1, 0.0 }
 0x1f1   : > { %v1490_v4 = vpack.c.bf16 %v1412_v0, %v1411_v63 }
 0x1f2   : > { %v1489_v5 = vpack.c.bf16 %v1410_v3, %v1409_v2 }
 0x1f4   : > { %v5207_v6 = vpop.f32.mrb[100].mxu0  ;;  %5337 = vmatprep.mubr.msk.bf16.mxu1 %vm1537_vm0, %v1489_v5 }
 0x1f5   : > { %v1202_v7 = vpop.f32.mrb[101].mxu0  ;;  %5338 = vmatmul.mubr.msk.bf16.gmra.mrb[96].mxu1 %vm1537_vm0, %v1490_v4  ;;  %v1415_v9 = vmax.f32 %v5207_v6, 0.0 }
 0x1f6   : > { %v5208_v8 = vpop.f32.mrb[102].mxu0  ;;  %v1413_v12 = vmax.f32 %v1202_v7, 0.0 }
 0x1f7   : > { %v1416_v10 = vmax.f32 %v5208_v8, 0.0  ;;  %v1205_v11 = vpop.f32.mrb[103].mxu0 }
 0x1f8   : > { %v1414_v13 = vmax.f32 %v1205_v11, 0.0 }
 0x1f9   : > { %v1492_v14 = vpack.c.bf16 %v1416_v10, %v1415_v9 }
 0x1fa   : > { %v1491_v15 = vpack.c.bf16 %v1414_v13, %v1413_v12 }
 0x1fc   : > { %v5211_v16 = vpop.f32.mrb[104].mxu0  ;;  %5341 = vmatprep.mubr.msk.bf16.mxu1 %vm1537_vm0, %v1491_v15 }
 0x1fd   : > { %v1218_v17 = vpop.f32.mrb[105].mxu0  ;;  %5342 = vmatmul.mubr.msk.bf16.gmra.mrb[100].mxu1 %vm1537_vm0, %v1492_v14  ;;  %v1419_v19 = vmax.f32 %v5211_v16, 0.0 }
 0x1fe   : > { %v5212_v18 = vpop.f32.mrb[106].mxu0  ;;  %v1417_v22 = vmax.f32 %v1218_v17, 0.0 }
 0x1ff   : > { %v1420_v20 = vmax.f32 %v5212_v18, 0.0  ;;  %v1221_v21 = vpop.f32.mrb[107].mxu0 }
 0x200   : > { %v1418_v23 = vmax.f32 %v1221_v21, 0.0 }
 0x201   : > { %v1494_v24 = vpack.c.bf16 %v1420_v20, %v1419_v19 }
 0x202   : > { %v1493_v25 = vpack.c.bf16 %v1418_v23, %v1417_v22 }
 0x204   : > { %v5215_v26 = vpop.f32.mrb[108].mxu0  ;;  %5345 = vmatprep.mubr.msk.bf16.mxu1 %vm1537_vm0, %v1493_v25 }
 0x205   : > { %v1234_v27 = vpop.f32.mrb[109].mxu0  ;;  %5346 = vmatmul.mubr.msk.bf16.gmra.mrb[104].mxu1 %vm1537_vm0, %v1494_v24  ;;  %v1423_v29 = vmax.f32 %v5215_v26, 0.0  ;;  %v6071_v26 = vld [vmem:[%s6369_s11] sm:$0xff]  }
 0x206   : > { %v5216_v28 = vpop.f32.mrb[110].mxu0  ;;  %v1421_v32 = vmax.f32 %v1234_v27, 0.0  ;;  %v3043_v27 = vunpack.c.l.bf16 %v6071_v26 }
 0x207   : > { %v1424_v30 = vmax.f32 %v5216_v28, 0.0  ;;  %v1237_v31 = vpop.f32.mrb[111].mxu0 }
 0x208   : > { %v1422_v33 = vmax.f32 %v1237_v31, 0.0  ;;  %v5243_v34 = vpop.f32.mrb[0].mxu1 }
 0x209   : > { %v1496_v35 = vpack.c.bf16 %v1424_v30, %v1423_v29  ;;  %v4177_v36 = vmul.f32 -1.442695, %v5243_v34  ;;  %v1764_v37 = vpop.f32.mrb[1].mxu1  ;;  %v6072_v30 = vld [vmem:[%s6369_s11 + $0x8] sm:$0xff]  }
 0x20a   : > { %v1495_v38 = vpack.c.bf16 %v1422_v33, %v1421_v32  ;;  %v4175_v39 = vmul.f32 -1.442695, %v1764_v37  ;;  %v5244_v40 = vpop.f32.mrb[2].mxu1  ;;  %v3045_v31 = vunpack.c.l.bf16 %v6072_v30  ;;  %v3046_v32 = vunpack.c.h.bf16 %v6072_v30 }
 0x20b   : > { %5559 = vpow2.f32 %v4177_v36  ;;  %v4178_v41 = vmul.f32 -1.442695, %v5244_v40  ;;  %v1767_v42 = vpop.f32.mrb[3].mxu1 }
 0x20c   : > { %5561 = vpow2.f32 %v4175_v39  ;;  %v4176_v43 = vmul.f32 -1.442695, %v1767_v42  ;;  %v5219_v44 = vpop.f32.mrb[112].mxu0  ;;  %5349 = vmatprep.mubr.msk.bf16.mxu1 %vm1537_vm0, %v1495_v38 }
 0x20d   : > { %5563 = vpow2.f32 %v4178_v41  ;;  %v1250_v45 = vpop.f32.mrb[113].mxu0  ;;  %5350 = vmatmul.mubr.msk.bf16.gmra.mrb[108].mxu1 %vm1537_vm0, %v1496_v35  ;;  %v1427_v47 = vmax.f32 %v5219_v44, 0.0 }
 0x20e   : > { %5565 = vpow2.f32 %v4176_v43  ;;  %v5220_v46 = vpop.f32.mrb[114].mxu0  ;;  %v1425_v50 = vmax.f32 %v1250_v45, 0.0 }
 0x20f   : > { %v1428_v48 = vmax.f32 %v5220_v46, 0.0  ;;  %v1253_v49 = vpop.f32.mrb[115].mxu0 }
 0x210   : > { %v1426_v51 = vmax.f32 %v1253_v49, 0.0  ;;  %v5247_v52 = vpop.f32.mrb[4].mxu1 }
 0x211   : > { %v1498_v53 = vpack.c.bf16 %v1428_v48, %v1427_v47  ;;  %v4181_v54 = vmul.f32 -1.442695, %v5247_v52  ;;  %v1780_v55 = vpop.f32.mrb[5].mxu1 }
 0x212   : > { %v1497_v56 = vpack.c.bf16 %v1426_v51, %v1425_v50  ;;  %v4179_v57 = vmul.f32 -1.442695, %v1780_v55  ;;  %v5248_v58 = vpop.f32.mrb[6].mxu1  ;;  %v3044_v50 = vunpack.c.h.bf16 %v6071_v26 }
 0x213   : > { %5567 = vpow2.f32 %v4181_v54  ;;  %v4182_v59 = vmul.f32 -1.442695, %v5248_v58  ;;  %v1783_v60 = vpop.f32.mrb[7].mxu1 }
 0x214   : > { %5569 = vpow2.f32 %v4179_v57  ;;  %v4180_v61 = vmul.f32 -1.442695, %v1783_v60  ;;  %v5223_v62 = vpop.f32.mrb[116].mxu0  ;;  %5353 = vmatprep.mubr.msk.bf16.mxu1 %vm1537_vm0, %v1497_v56 }
 0x215   : > { %v5560_v63 = vpop.eup %5559  ;;  %5571 = vpow2.f32 %v4182_v59  ;;  %v1266_v0 = vpop.f32.mrb[117].mxu0  ;;  %5354 = vmatmul.mubr.msk.bf16.gmra.mrb[112].mxu1 %vm1537_vm0, %v1498_v53  ;;  %v1431_v6 = vmax.f32 %v5223_v62, 0.0  ;;  %v6538_v59 = vld [vmem:[%s6369_s11 + $0x10] sm:$0xff]  }
 0x216   : > { %v5562_v1 = vpop.eup %5561  ;;  %v2661_v2 = vadd.f32 1.0, %v5560_v63  ;;  %5573 = vpow2.f32 %v4180_v61  ;;  %v5224_v3 = vpop.f32.mrb[118].mxu0  ;;  %v1429_v11 = vmax.f32 %v1266_v0, 0.0  ;;  %v3047_v60 = vunpack.c.l.bf16 %v6538_v59 }
 0x217   : > { %v5564_v4 = vpop.eup %5563  ;;  %v2659_v5 = vadd.f32 1.0, %v5562_v1  ;;  %v1432_v7 = vmax.f32 %v5224_v3, 0.0  ;;  %v1269_v8 = vpop.f32.mrb[119].mxu0  ;;  %v3048_v1 = vunpack.c.h.bf16 %v6538_v59 }
 0x218   : > { %v5566_v9 = vpop.eup %5565  ;;  %5575 = vrcp.f32 %v2661_v2  ;;  %v2662_v10 = vadd.f32 1.0, %v5564_v4  ;;  %v1430_v12 = vmax.f32 %v1269_v8, 0.0  ;;  %v5251_v13 = vpop.f32.mrb[8].mxu1  ;;  %v6074_v2 = vld [vmem:[%s6369_s11 + $0x18] sm:$0xff]  }
 0x219   : > { %5577 = vrcp.f32 %v2659_v5  ;;  %v2660_v14 = vadd.f32 1.0, %v5566_v9  ;;  %v1500_v15 = vpack.c.bf16 %v1432_v7, %v1431_v6  ;;  %v4185_v16 = vmul.f32 -1.442695, %v5251_v13  ;;  %v1796_v17 = vpop.f32.mrb[9].mxu1 }
 0x21a   : > { %5579 = vrcp.f32 %v2662_v10  ;;  %v1499_v18 = vpack.c.bf16 %v1430_v12, %v1429_v11  ;;  %v4183_v19 = vmul.f32 -1.442695, %v1796_v17  ;;  %v5252_v20 = vpop.f32.mrb[10].mxu1  ;;  %v3049_v3 = vunpack.c.l.bf16 %v6074_v2 }
 0x21b   : > { %5581 = vrcp.f32 %v2660_v14  ;;  %v4186_v21 = vmul.f32 -1.442695, %v5252_v20  ;;  %v1799_v22 = vpop.f32.mrb[11].mxu1  ;;  %v3050_v7 = vunpack.c.h.bf16 %v6074_v2 }
 0x21c   : > { %5583 = vpow2.f32 %v4185_v16  ;;  %v4184_v23 = vmul.f32 -1.442695, %v1799_v22  ;;  %v5227_v24 = vpop.f32.mrb[120].mxu0  ;;  %5357 = vmatprep.mubr.msk.bf16.mxu1 %vm1537_vm0, %v1499_v18 }
 0x21d   : > { %v5568_v25 = vpop.eup %5567  ;;  %5585 = vpow2.f32 %v4183_v19  ;;  %v1282_v28 = vpop.f32.mrb[121].mxu0  ;;  %5358 = vmatmul.mubr.msk.bf16.gmra.mrb[116].mxu1 %vm1537_vm0, %v1500_v15  ;;  %v1435_v37 = vmax.f32 %v5227_v24, 0.0 }
 0x21e   : > { %v5570_v29 = vpop.eup %5569  ;;  %v2665_v33 = vadd.f32 1.0, %v5568_v25  ;;  %5587 = vpow2.f32 %v4186_v21  ;;  %v5228_v34 = vpop.f32.mrb[122].mxu0  ;;  %v1433_v42 = vmax.f32 %v1282_v28, 0.0 }
 0x21f   : > { %v5572_v35 = vpop.eup %5571  ;;  %v2663_v36 = vadd.f32 1.0, %v5570_v29  ;;  %5589 = vpow2.f32 %v4184_v23  ;;  %v1436_v38 = vmax.f32 %v5228_v34, 0.0  ;;  %v1285_v39 = vpop.f32.mrb[123].mxu0 }
 0x220   : > { %v5574_v40 = vpop.eup %5573  ;;  %5591 = vrcp.f32 %v2665_v33  ;;  %v2666_v41 = vadd.f32 1.0, %v5572_v35  ;;  %v1434_v43 = vmax.f32 %v1285_v39, 0.0  ;;  %v5255_v44 = vpop.f32.mrb[12].mxu1 }
 0x221   : > { %5593 = vrcp.f32 %v2663_v36  ;;  %v2664_v45 = vadd.f32 1.0, %v5574_v40  ;;  %v1502_v46 = vpack.c.bf16 %v1436_v38, %v1435_v37  ;;  %v4189_v47 = vmul.f32 -1.442695, %v5255_v44  ;;  %v1812_v48 = vpop.f32.mrb[13].mxu1 }
 0x222   : > { %v5576_v49 = vpop.eup %5575  ;;  %5595 = vrcp.f32 %v2666_v41  ;;  %v1501_v51 = vpack.c.bf16 %v1434_v43, %v1433_v42  ;;  %v4187_v52 = vmul.f32 -1.442695, %v1812_v48  ;;  %v5256_v53 = vpop.f32.mrb[14].mxu1 }
 0x223   : > { %v5578_v54 = vpop.eup %5577  ;;  %v3173_v55 = vmul.f32 %v5576_v49, %v3045_v31  ;;  %5597 = vrcp.f32 %v2664_v45  ;;  %v4190_v56 = vmul.f32 -1.442695, %v5256_v53  ;;  %v1815_v57 = vpop.f32.mrb[15].mxu1  ;;  %v6076_v53 = vld [vmem:[%s6369_s11 + $0x20] sm:$0xff]  }
 0x224   : > { %v5580_v58 = vpop.eup %5579  ;;  %v3171_v61 = vmul.f32 %v5578_v54, %v3043_v27  ;;  %5599 = vpow2.f32 %v4189_v47  ;;  %v4188_v62 = vmul.f32 -1.442695, %v1815_v57  ;;  %v5231_v63 = vpop.f32.mrb[124].mxu0  ;;  %5361 = vmatprep.mubr.msk.bf16.mxu1 %vm1537_vm0, %v1501_v51  ;;  %v6075_v47 = vld [vmem:[%s6369_s11 + $0x28] sm:$0xff]   ;;  %v3051_v54 = vunpack.c.l.bf16 %v6076_v53 }
 0x225   : > { %v5582_v0 = vpop.eup %5581  ;;  %v3174_v4 = vmul.f32 %v5580_v58, %v3046_v32  ;;  %5601 = vpow2.f32 %v4187_v52  ;;  %v1298_v5 = vpop.f32.mrb[125].mxu0  ;;  %5362 = vmatmul.mubr.msk.bf16.gmra.mrb[120].mxu1 %vm1537_vm0, %v1502_v46  ;;  %v1439_v9 = vmax.f32 %v5231_v63, 0.0  ;;  %v3053_v48 = vunpack.c.l.bf16 %v6075_v47 }
 0x226   : > { %v5584_v6 = vpop.eup %5583  ;;  %v3172_v8 = vmul.f32 %v5582_v0, %v3044_v50  ;;  %5603 = vpow2.f32 %v4190_v56  ;;  %v5232_v10 = vpop.f32.mrb[126].mxu0  ;;  %v1437_v19 = vmax.f32 %v1298_v5, 0.0  ;;  %v3054_v58 = vunpack.c.h.bf16 %v6075_v47 }
 0x227   : > { %v5586_v11 = vpop.eup %5585  ;;  %v4574_v12 = vpack.c.bf16 %v3174_v4, %v3173_v55  ;;  %v2669_v13 = vadd.f32 1.0, %v5584_v6  ;;  %5605 = vpow2.f32 %v4188_v62  ;;  %v1440_v14 = vmax.f32 %v5232_v10, 0.0  ;;  %v1301_v15 = vpop.f32.mrb[127].mxu0 }
 0x228   : > { %v5588_v16 = vpop.eup %5587  ;;  %v4569_v17 = vpack.c.bf16 %v3172_v8, %v3171_v61  ;;  %v2667_v18 = vadd.f32 1.0, %v5586_v11  ;;  %v1438_v20 = vmax.f32 %v1301_v15, 0.0  ;;  %v5259_v21 = vpop.f32.mrb[16].mxu1  ;;  %v3052_v63 = vunpack.c.h.bf16 %v6076_v53 }
 0x229   : > { %v5590_v22 = vpop.eup %5589  ;;  %4886 = vst [vmem:[%s6547_s26 + $0x8] sm:$0xff] %v4574_v12   ;;  %5607 = vrcp.f32 %v2669_v13  ;;  %v2670_v23 = vadd.f32 1.0, %v5588_v16  ;;  %v1504_v24 = vpack.c.bf16 %v1440_v14, %v1439_v9  ;;  %v4193_v25 = vmul.f32 -1.442695, %v5259_v21  ;;  %v1828_v26 = vpop.f32.mrb[17].mxu1  ;;  %v6077_v12 = vld [vmem:[%s6369_s11 + $0x38] sm:$0xff]  }
 0x22a   : > { %v5592_v27 = vpop.eup %5591  ;;  %4570 = vst [vmem:[%s6547_s26] sm:$0xff] %v4569_v17   ;;  %5609 = vrcp.f32 %v2667_v18  ;;  %v2668_v28 = vadd.f32 1.0, %v5590_v22  ;;  %v1503_v29 = vpack.c.bf16 %v1438_v20, %v1437_v19  ;;  %v4191_v30 = vmul.f32 -1.442695, %v1828_v26  ;;  %v5260_v31 = vpop.f32.mrb[18].mxu1  ;;  %v6078_v18 = vld [vmem:[%s6369_s11 + $0x30] sm:$0xff]  }
 0x22b   : > { %v5594_v32 = vpop.eup %5593  ;;  %v3177_v33 = vmul.f32 %v5592_v27, %v3049_v3  ;;  %5611 = vrcp.f32 %v2670_v23  ;;  %v4194_v34 = vmul.f32 -1.442695, %v5260_v31  ;;  %v1831_v35 = vpop.f32.mrb[19].mxu1  ;;  %v3057_v13 = vunpack.c.l.bf16 %v6077_v12 }
 0x22c   : > { %v5596_v36 = vpop.eup %5595  ;;  %v3175_v37 = vmul.f32 %v5594_v32, %v3047_v60  ;;  %5613 = vrcp.f32 %v2668_v28  ;;  %v4192_v38 = vmul.f32 -1.442695, %v1831_v35  ;;  %5365 = vmatprep.mubr.msk.bf16.mxu1 %vm1537_vm0, %v1503_v29  ;;  %v3055_v19 = vunpack.c.l.bf16 %v6078_v18 }
 0x22d   : > { %v5598_v39 = vpop.eup %5597  ;;  %v3178_v40 = vmul.f32 %v5596_v36, %v3050_v7  ;;  %5615 = vpow2.f32 %v4193_v25  ;;  %5366 = vmatmul.mubr.msk.bf16.gmra.mrb[124].mxu1 %vm1537_vm0, %v1504_v24  ;;  %v3058_v24 = vunpack.c.h.bf16 %v6077_v12  ;;  %v3056_v29 = vunpack.c.h.bf16 %v6078_v18 }
 0x22e   : > { %v5600_v41 = vpop.eup %5599  ;;  %v3176_v42 = vmul.f32 %v5598_v39, %v3048_v1  ;;  %5617 = vpow2.f32 %v4191_v30 }
 0x22f   : > { %v5602_v43 = vpop.eup %5601  ;;  %v4584_v44 = vpack.c.bf16 %v3178_v40, %v3177_v33  ;;  %v2673_v45 = vadd.f32 1.0, %v5600_v41  ;;  %5619 = vpow2.f32 %v4194_v34 }
 0x230   : > { %v5604_v46 = vpop.eup %5603  ;;  %v4579_v49 = vpack.c.bf16 %v3176_v42, %v3175_v37  ;;  %v2671_v50 = vadd.f32 1.0, %v5602_v43  ;;  %5621 = vpow2.f32 %v4192_v38  ;;  %v5263_v51 = vpop.f32.mrb[20].mxu1 }
 0x231   : > { %v5606_v52 = vpop.eup %5605  ;;  %4888 = vst [vmem:[%s6547_s26 + $0x18] sm:$0xff] %v4584_v44   ;;  %5623 = vrcp.f32 %v2673_v45  ;;  %v2674_v55 = vadd.f32 1.0, %v5604_v46  ;;  %v4197_v56 = vmul.f32 -1.442695, %v5263_v51  ;;  %v1844_v57 = vpop.f32.mrb[21].mxu1 }
 0x232   : > { %4887 = vst [vmem:[%s6547_s26 + $0x10] sm:$0xff] %v4579_v49   ;;  %5625 = vrcp.f32 %v2671_v50  ;;  %v2672_v59 = vadd.f32 1.0, %v5606_v52  ;;  %v4195_v60 = vmul.f32 -1.442695, %v1844_v57  ;;  %v5264_v61 = vpop.f32.mrb[22].mxu1 }
 0x233   : > { %v5608_v62 = vpop.eup %5607  ;;  %5627 = vrcp.f32 %v2674_v55  ;;  %v4198_v0 = vmul.f32 -1.442695, %v5264_v61  ;;  %v1847_v1 = vpop.f32.mrb[23].mxu1 }
 0x234   : > { %v5610_v2 = vpop.eup %5609  ;;  %v3181_v3 = vmul.f32 %v5608_v62, %v3053_v48  ;;  %5629 = vrcp.f32 %v2672_v59  ;;  %v4196_v4 = vmul.f32 -1.442695, %v1847_v1  ;;  %v6079_v48 = vld [vmem:[%s6369_s11 + $0x48] sm:$0xff]  }
 0x235   : > { %v5612_v5 = vpop.eup %5611  ;;  %v3179_v6 = vmul.f32 %v5610_v2, %v3051_v54  ;;  %5631 = vpow2.f32 %v4197_v56  ;;  %v3061_v49 = vunpack.c.l.bf16 %v6079_v48  ;;  %v6080_v54 = vld [vmem:[%s6369_s11 + $0x40] sm:$0xff]   ;;  %v3062_v59 = vunpack.c.h.bf16 %v6079_v48 }
 0x236   : > { %v5614_v7 = vpop.eup %5613  ;;  %v3182_v8 = vmul.f32 %v5612_v5, %v3054_v58  ;;  %5633 = vpow2.f32 %v4195_v60  ;;  %v3059_v55 = vunpack.c.l.bf16 %v6080_v54 }
 0x237   : > { %v5616_v9 = vpop.eup %5615  ;;  %v3180_v10 = vmul.f32 %v5614_v7, %v3052_v63  ;;  %5635 = vpow2.f32 %v4198_v0  ;;  %v3060_v0 = vunpack.c.h.bf16 %v6080_v54 }
 0x238   : > { %v5618_v11 = vpop.eup %5617  ;;  %v4594_v14 = vpack.c.bf16 %v3182_v8, %v3181_v3  ;;  %v2677_v15 = vadd.f32 1.0, %v5616_v9  ;;  %5637 = vpow2.f32 %v4196_v4  ;;  %v5267_v16 = vpop.f32.mrb[24].mxu1 }
 0x239   : > { %v5620_v17 = vpop.eup %5619  ;;  %v4589_v20 = vpack.c.bf16 %v3180_v10, %v3179_v6  ;;  %v2675_v21 = vadd.f32 1.0, %v5618_v11  ;;  %v1860_v22 = vpop.f32.mrb[25].mxu1  ;;  %v4201_v26 = vmul.f32 -1.442695, %v5267_v16 }
 0x23a   : > { %v5622_v23 = vpop.eup %5621  ;;  %4890 = vst [vmem:[%s6547_s26 + $0x28] sm:$0xff] %v4594_v14   ;;  %5639 = vrcp.f32 %v2677_v15  ;;  %v2678_v25 = vadd.f32 1.0, %v5620_v17  ;;  %v5268_v27 = vpop.f32.mrb[26].mxu1  ;;  %v4199_v31 = vmul.f32 -1.442695, %v1860_v22 }
 0x23b   : > { %v5624_v28 = vpop.eup %5623  ;;  %4889 = vst [vmem:[%s6547_s26 + $0x20] sm:$0xff] %v4589_v20   ;;  %5641 = vrcp.f32 %v2675_v21  ;;  %v2676_v30 = vadd.f32 1.0, %v5622_v23  ;;  %v1863_v32 = vpop.f32.mrb[27].mxu1  ;;  %v4202_v35 = vmul.f32 -1.442695, %v5268_v27 }
 0x23c   : > { %v5626_v33 = vpop.eup %5625  ;;  %v3185_v34 = vmul.f32 %v5624_v28, %v3057_v13  ;;  %5643 = vrcp.f32 %v2678_v25  ;;  %v4200_v38 = vmul.f32 -1.442695, %v1863_v32  ;;  %v6081_v13 = vld [vmem:[%s6369_s11 + $0x58] sm:$0xff]  }
 0x23d   : > { %v5628_v36 = vpop.eup %5627  ;;  %v3183_v37 = vmul.f32 %v5626_v33, %v3055_v19  ;;  %5645 = vrcp.f32 %v2676_v30  ;;  %v3065_v14 = vunpack.c.l.bf16 %v6081_v13  ;;  %v6082_v19 = vld [vmem:[%s6369_s11 + $0x50] sm:$0xff]   ;;  %v3066_v25 = vunpack.c.h.bf16 %v6081_v13 }
 0x23e   : > { %v5630_v39 = vpop.eup %5629  ;;  %v3186_v40 = vmul.f32 %v5628_v36, %v3058_v24  ;;  %5647 = vpow2.f32 %v4201_v26  ;;  %v3063_v20 = vunpack.c.l.bf16 %v6082_v19  ;;  %v3064_v30 = vunpack.c.h.bf16 %v6082_v19 }
 0x23f   : > { %v5632_v41 = vpop.eup %5631  ;;  %v3184_v42 = vmul.f32 %v5630_v39, %v3056_v29  ;;  %5649 = vpow2.f32 %v4199_v31 }
 0x240   : > { %v5634_v43 = vpop.eup %5633  ;;  %v4604_v44 = vpack.c.bf16 %v3186_v40, %v3185_v34  ;;  %v2681_v45 = vadd.f32 1.0, %v5632_v41  ;;  %5651 = vpow2.f32 %v4202_v35  ;;  %v5271_v46 = vpop.f32.mrb[28].mxu1 }
 0x241   : > { %v5636_v47 = vpop.eup %5635  ;;  %v4599_v50 = vpack.c.bf16 %v3184_v42, %v3183_v37  ;;  %v2679_v51 = vadd.f32 1.0, %v5634_v43  ;;  %5653 = vpow2.f32 %v4200_v38  ;;  %v1876_v52 = vpop.f32.mrb[29].mxu1  ;;  %v4205_v57 = vmul.f32 -1.442695, %v5271_v46 }
 0x242   : > { %v5638_v53 = vpop.eup %5637  ;;  %4892 = vst [vmem:[%s6547_s26 + $0x38] sm:$0xff] %v4604_v44   ;;  %5655 = vrcp.f32 %v2681_v45  ;;  %v2682_v56 = vadd.f32 1.0, %v5636_v47  ;;  %v5272_v58 = vpop.f32.mrb[30].mxu1  ;;  %v4203_v61 = vmul.f32 -1.442695, %v1876_v52 }
 0x243   : > { %4891 = vst [vmem:[%s6547_s26 + $0x30] sm:$0xff] %v4599_v50   ;;  %5657 = vrcp.f32 %v2679_v51  ;;  %v2680_v60 = vadd.f32 1.0, %v5638_v53  ;;  %v1879_v62 = vpop.f32.mrb[31].mxu1  ;;  %v4206_v1 = vmul.f32 -1.442695, %v5272_v58 }
 0x244   : > { %v5640_v63 = vpop.eup %5639  ;;  %5659 = vrcp.f32 %v2682_v56  ;;  %v4204_v4 = vmul.f32 -1.442695, %v1879_v62 }
 0x245   : > { %v5642_v2 = vpop.eup %5641  ;;  %v3189_v3 = vmul.f32 %v5640_v63, %v3061_v49  ;;  %5661 = vrcp.f32 %v2680_v60  ;;  %v6083_v49 = vld [vmem:[%s6369_s11 + $0x68] sm:$0xff]  }
 0x246   : > { %v5644_v5 = vpop.eup %5643  ;;  %v3187_v6 = vmul.f32 %v5642_v2, %v3059_v55  ;;  %5663 = vpow2.f32 %v4205_v57  ;;  %v3069_v50 = vunpack.c.l.bf16 %v6083_v49  ;;  %v6084_v55 = vld [vmem:[%s6369_s11 + $0x60] sm:$0xff]   ;;  %v3070_v60 = vunpack.c.h.bf16 %v6083_v49 }
 0x247   : > { %v5646_v7 = vpop.eup %5645  ;;  %v3190_v8 = vmul.f32 %v5644_v5, %v3062_v59  ;;  %5665 = vpow2.f32 %v4203_v61  ;;  %v3067_v56 = vunpack.c.l.bf16 %v6084_v55 }
 0x248   : > { %v5648_v9 = vpop.eup %5647  ;;  %v3188_v10 = vmul.f32 %v5646_v7, %v3060_v0  ;;  %5667 = vpow2.f32 %v4206_v1  ;;  %v5275_v11 = vpop.f32.mrb[32].mxu1  ;;  %v3068_v0 = vunpack.c.h.bf16 %v6084_v55 }
 0x249   : > { %v5650_v12 = vpop.eup %5649  ;;  %v4614_v15 = vpack.c.bf16 %v3190_v8, %v3189_v3  ;;  %v2685_v16 = vadd.f32 1.0, %v5648_v9  ;;  %5669 = vpow2.f32 %v4204_v4  ;;  %v1892_v17 = vpop.f32.mrb[33].mxu1  ;;  %v4209_v27 = vmul.f32 -1.442695, %v5275_v11 }
 0x24a   : > { %v5652_v18 = vpop.eup %5651  ;;  %v4609_v21 = vpack.c.bf16 %v3188_v10, %v3187_v6  ;;  %v2683_v22 = vadd.f32 1.0, %v5650_v12  ;;  %v5276_v23 = vpop.f32.mrb[34].mxu1  ;;  %v4207_v32 = vmul.f32 -1.442695, %v1892_v17 }
 0x24b   : > { %v5654_v24 = vpop.eup %5653  ;;  %4894 = vst [vmem:[%s6547_s26 + $0x48] sm:$0xff] %v4614_v15   ;;  %5671 = vrcp.f32 %v2685_v16  ;;  %v2686_v26 = vadd.f32 1.0, %v5652_v18  ;;  %v1895_v28 = vpop.f32.mrb[35].mxu1  ;;  %v4210_v35 = vmul.f32 -1.442695, %v5276_v23  ;;  %v6085_v15 = vld [vmem:[%s6369_s11 + $0x78] sm:$0xff]  }
 0x24c   : > { %v5656_v29 = vpop.eup %5655  ;;  %4893 = vst [vmem:[%s6547_s26 + $0x40] sm:$0xff] %v4609_v21   ;;  %5673 = vrcp.f32 %v2683_v22  ;;  %v2684_v31 = vadd.f32 1.0, %v5654_v24  ;;  %v4208_v38 = vmul.f32 -1.442695, %v1895_v28  ;;  %v3073_v16 = vunpack.c.l.bf16 %v6085_v15  ;;  %v6086_v21 = vld [vmem:[%s6369_s11 + $0x70] sm:$0xff]  }
 0x24d   : > { %v5658_v33 = vpop.eup %5657  ;;  %v3193_v34 = vmul.f32 %v5656_v29, %v3065_v14  ;;  %5675 = vrcp.f32 %v2686_v26  ;;  %v3071_v22 = vunpack.c.l.bf16 %v6086_v21 }
 0x24e   : > { %v5660_v36 = vpop.eup %5659  ;;  %v3191_v37 = vmul.f32 %v5658_v33, %v3063_v20  ;;  %5677 = vrcp.f32 %v2684_v31  ;;  %v3072_v31 = vunpack.c.h.bf16 %v6086_v21 }
 0x24f   : > { %v5662_v39 = vpop.eup %5661  ;;  %v3194_v40 = vmul.f32 %v5660_v36, %v3066_v25  ;;  %5679 = vpow2.f32 %v4209_v27  ;;  %v3074_v27 = vunpack.c.h.bf16 %v6085_v15 }
 0x250   : > { %v5664_v41 = vpop.eup %5663  ;;  %v3192_v42 = vmul.f32 %v5662_v39, %v3064_v30  ;;  %5681 = vpow2.f32 %v4207_v32  ;;  %v5279_v43 = vpop.f32.mrb[36].mxu1 }
 0x251   : > { %v5666_v44 = vpop.eup %5665  ;;  %v4624_v45 = vpack.c.bf16 %v3194_v40, %v3193_v34  ;;  %v2689_v46 = vadd.f32 1.0, %v5664_v41  ;;  %5683 = vpow2.f32 %v4210_v35  ;;  %v1908_v47 = vpop.f32.mrb[37].mxu1  ;;  %v4213_v58 = vmul.f32 -1.442695, %v5279_v43 }
 0x252   : > { %v5668_v48 = vpop.eup %5667  ;;  %v4619_v51 = vpack.c.bf16 %v3192_v42, %v3191_v37  ;;  %v2687_v52 = vadd.f32 1.0, %v5666_v44  ;;  %5685 = vpow2.f32 %v4208_v38  ;;  %v5280_v53 = vpop.f32.mrb[38].mxu1  ;;  %v4211_v62 = vmul.f32 -1.442695, %v1908_v47 }
 0x253   : > { %v5670_v54 = vpop.eup %5669  ;;  %4896 = vst [vmem:[%s6547_s26 + $0x58] sm:$0xff] %v4624_v45   ;;  %5687 = vrcp.f32 %v2689_v46  ;;  %v2690_v57 = vadd.f32 1.0, %v5668_v48  ;;  %v1911_v59 = vpop.f32.mrb[39].mxu1  ;;  %v4214_v1 = vmul.f32 -1.442695, %v5280_v53 }
 0x254   : > { %4895 = vst [vmem:[%s6547_s26 + $0x50] sm:$0xff] %v4619_v51   ;;  %5689 = vrcp.f32 %v2687_v52  ;;  %v2688_v61 = vadd.f32 1.0, %v5670_v54  ;;  %v4212_v4 = vmul.f32 -1.442695, %v1911_v59  ;;  %v6087_v51 = vld [vmem:[%s6369_s11 + $0x88] sm:$0xff]  }
 0x255   : > { %v5672_v63 = vpop.eup %5671  ;;  %5691 = vrcp.f32 %v2690_v57  ;;  %v3077_v52 = vunpack.c.l.bf16 %v6087_v51  ;;  %v6088_v57 = vld [vmem:[%s6369_s11 + $0x80] sm:$0xff]  }
 0x256   : > { %v5674_v2 = vpop.eup %5673  ;;  %v3197_v3 = vmul.f32 %v5672_v63, %v3069_v50  ;;  %5693 = vrcp.f32 %v2688_v61  ;;  %v3078_v61 = vunpack.c.h.bf16 %v6087_v51 }
 0x257   : > { %v5676_v5 = vpop.eup %5675  ;;  %v3195_v6 = vmul.f32 %v5674_v2, %v3067_v56  ;;  %5695 = vpow2.f32 %v4213_v58  ;;  %v3075_v58 = vunpack.c.l.bf16 %v6088_v57 }
 0x258   : > { %v5678_v7 = vpop.eup %5677  ;;  %v3198_v8 = vmul.f32 %v5676_v5, %v3070_v60  ;;  %5697 = vpow2.f32 %v4211_v62  ;;  %v5283_v9 = vpop.f32.mrb[40].mxu1 }
 0x259   : > { %v5680_v10 = vpop.eup %5679  ;;  %v3196_v11 = vmul.f32 %v5678_v7, %v3068_v0  ;;  %5699 = vpow2.f32 %v4214_v1  ;;  %v4217_v12 = vmul.f32 -1.442695, %v5283_v9  ;;  %v1924_v13 = vpop.f32.mrb[41].mxu1  ;;  %v3076_v1 = vunpack.c.h.bf16 %v6088_v57  ;;  %v6092_v57 = vld [vmem:[%s6369_s11 + $0xa0] sm:$0xff]  }
 0x25a   : > { %v5682_v14 = vpop.eup %5681  ;;  %v4634_v17 = vpack.c.bf16 %v3198_v8, %v3197_v3  ;;  %v2693_v18 = vadd.f32 1.0, %v5680_v10  ;;  %5701 = vpow2.f32 %v4212_v4  ;;  %v5284_v19 = vpop.f32.mrb[42].mxu1  ;;  %v4215_v29 = vmul.f32 -1.442695, %v1924_v13 }
 0x25b   : > { %v5684_v20 = vpop.eup %5683  ;;  %v4629_v23 = vpack.c.bf16 %v3196_v11, %v3195_v6  ;;  %v2691_v24 = vadd.f32 1.0, %v5682_v14  ;;  %5703 = vpow2.f32 %v4217_v12  ;;  %v1927_v25 = vpop.f32.mrb[43].mxu1  ;;  %v4218_v33 = vmul.f32 -1.442695, %v5284_v19 }
 0x25c   : > { %v5686_v26 = vpop.eup %5685  ;;  %4898 = vst [vmem:[%s6547_s26 + $0x68] sm:$0xff] %v4634_v17   ;;  %5705 = vrcp.f32 %v2693_v18  ;;  %v2694_v28 = vadd.f32 1.0, %v5684_v20  ;;  %v4216_v36 = vmul.f32 -1.442695, %v1927_v25  ;;  %v6089_v18 = vld [vmem:[%s6369_s11 + $0x98] sm:$0xff]  }
 0x25d   : > { %v5688_v30 = vpop.eup %5687  ;;  %4897 = vst [vmem:[%s6547_s26 + $0x60] sm:$0xff] %v4629_v23   ;;  %5707 = vrcp.f32 %v2691_v24  ;;  %v2692_v32 = vadd.f32 1.0, %v5686_v26  ;;  %v3081_v19 = vunpack.c.l.bf16 %v6089_v18  ;;  %v6090_v24 = vld [vmem:[%s6369_s11 + $0x90] sm:$0xff]  }
 0x25e   : > { %v5690_v34 = vpop.eup %5689  ;;  %v3201_v35 = vmul.f32 %v5688_v30, %v3073_v16  ;;  %5709 = vrcp.f32 %v2694_v28  ;;  %v3079_v25 = vunpack.c.l.bf16 %v6090_v24 }
 0x25f   : > { %v5692_v37 = vpop.eup %5691  ;;  %v3199_v38 = vmul.f32 %v5690_v34, %v3071_v22  ;;  %5711 = vrcp.f32 %v2692_v32 }
 0x260   : > { %v5694_v39 = vpop.eup %5693  ;;  %v3202_v40 = vmul.f32 %v5692_v37, %v3074_v27  ;;  %5713 = vpow2.f32 %v4215_v29  ;;  %v5287_v41 = vpop.f32.mrb[44].mxu1  ;;  %v3082_v29 = vunpack.c.h.bf16 %v6089_v18  ;;  %v6091_v37 = vld [vmem:[%s6369_s11 + $0xa8] sm:$0xff]  }
 0x261   : > { %v5696_v42 = vpop.eup %5695  ;;  %v3200_v43 = vmul.f32 %v5694_v39, %v3072_v31  ;;  %5715 = vpow2.f32 %v4218_v33  ;;  %v4221_v44 = vmul.f32 -1.442695, %v5287_v41  ;;  %v1940_v45 = vpop.f32.mrb[45].mxu1  ;;  %v3080_v33 = vunpack.c.h.bf16 %v6090_v24 }
 0x262   : > { %v5698_v46 = vpop.eup %5697  ;;  %v4644_v47 = vpack.c.bf16 %v3202_v40, %v3201_v35  ;;  %v2697_v48 = vadd.f32 1.0, %v5696_v42  ;;  %5717 = vpow2.f32 %v4216_v36  ;;  %v5288_v49 = vpop.f32.mrb[46].mxu1  ;;  %v4219_v63 = vmul.f32 -1.442695, %v1940_v45 }
 0x263   : > { %v5700_v50 = vpop.eup %5699  ;;  %v4639_v53 = vpack.c.bf16 %v3200_v43, %v3199_v38  ;;  %v2695_v54 = vadd.f32 1.0, %v5698_v46  ;;  %5719 = vpow2.f32 %v4221_v44  ;;  %v1943_v55 = vpop.f32.mrb[47].mxu1  ;;  %v4222_v3 = vmul.f32 -1.442695, %v5288_v49 }
 0x264   : > { %v5702_v56 = vpop.eup %5701  ;;  %4900 = vst [vmem:[%s6547_s26 + $0x78] sm:$0xff] %v4644_v47   ;;  %5721 = vrcp.f32 %v2697_v48  ;;  %v2698_v59 = vadd.f32 1.0, %v5700_v50  ;;  %v4220_v6 = vmul.f32 -1.442695, %v1943_v55  ;;  %v3085_v38 = vunpack.c.l.bf16 %v6091_v37 }
 0x265   : > { %v5704_v60 = vpop.eup %5703  ;;  %4899 = vst [vmem:[%s6547_s26 + $0x70] sm:$0xff] %v4639_v53   ;;  %5723 = vrcp.f32 %v2695_v54  ;;  %v2696_v62 = vadd.f32 1.0, %v5702_v56 }
 0x266   : > { %v5706_v0 = vpop.eup %5705  ;;  %5725 = vrcp.f32 %v2698_v59  ;;  %v2701_v2 = vadd.f32 1.0, %v5704_v60 }
 0x267   : > { %v5708_v4 = vpop.eup %5707  ;;  %v3205_v5 = vmul.f32 %v5706_v0, %v3077_v52  ;;  %5727 = vrcp.f32 %v2696_v62  ;;  %v3086_v62 = vunpack.c.h.bf16 %v6091_v37 }
 0x268   : > { %v5710_v7 = vpop.eup %5709  ;;  %v3203_v8 = vmul.f32 %v5708_v4, %v3075_v58  ;;  %5729 = vrcp.f32 %v2701_v2  ;;  %v5291_v9 = vpop.f32.mrb[48].mxu1  ;;  %v3083_v58 = vunpack.c.l.bf16 %v6092_v57 }
 0x269   : > { %v5712_v10 = vpop.eup %5711  ;;  %v3206_v11 = vmul.f32 %v5710_v7, %v3078_v61  ;;  %5731 = vpow2.f32 %v4219_v63  ;;  %v4225_v12 = vmul.f32 -1.442695, %v5291_v9  ;;  %v1956_v13 = vpop.f32.mrb[49].mxu1 }
 0x26a   : > { %v5714_v14 = vpop.eup %5713  ;;  %v3204_v15 = vmul.f32 %v5712_v10, %v3076_v1  ;;  %5733 = vpow2.f32 %v4222_v3  ;;  %v5292_v16 = vpop.f32.mrb[50].mxu1  ;;  %v4223_v31 = vmul.f32 -1.442695, %v1956_v13  ;;  %v3084_v1 = vunpack.c.h.bf16 %v6092_v57 }
 0x26b   : > { %v5716_v17 = vpop.eup %5715  ;;  %v4654_v20 = vpack.c.bf16 %v3206_v11, %v3205_v5  ;;  %v2699_v21 = vadd.f32 1.0, %v5714_v14  ;;  %5735 = vpow2.f32 %v4220_v6  ;;  %v1959_v22 = vpop.f32.mrb[51].mxu1  ;;  %v4226_v35 = vmul.f32 -1.442695, %v5292_v16  ;;  %v6093_v5 = vld [vmem:[%s6369_s11 + $0xb8] sm:$0xff]  }
 0x26c   : > { %v5718_v23 = vpop.eup %5717  ;;  %v4649_v26 = vpack.c.bf16 %v3204_v15, %v3203_v8  ;;  %v2702_v27 = vadd.f32 1.0, %v5716_v17  ;;  %5737 = vpow2.f32 %v4225_v12  ;;  %v4224_v40 = vmul.f32 -1.442695, %v1959_v22 }
 0x26d   : > { %v5720_v28 = vpop.eup %5719  ;;  %4902 = vst [vmem:[%s6547_s26 + $0x88] sm:$0xff] %v4654_v20   ;;  %5739 = vrcp.f32 %v2699_v21  ;;  %v2700_v30 = vadd.f32 1.0, %v5718_v23  ;;  %v3089_v6 = vunpack.c.l.bf16 %v6093_v5 }
 0x26e   : > { %v5722_v32 = vpop.eup %5721  ;;  %4901 = vst [vmem:[%s6547_s26 + $0x80] sm:$0xff] %v4649_v26   ;;  %5741 = vrcp.f32 %v2702_v27  ;;  %v2705_v34 = vadd.f32 1.0, %v5720_v28  ;;  %v6094_v28 = vld [vmem:[%s6369_s11 + $0xb0] sm:$0xff]  }
 0x26f   : > { %v5724_v36 = vpop.eup %5723  ;;  %v3209_v39 = vmul.f32 %v5722_v32, %v3081_v19  ;;  %5743 = vrcp.f32 %v2700_v30  ;;  %v3090_v32 = vunpack.c.h.bf16 %v6093_v5 }
 0x270   : > { %v5726_v41 = vpop.eup %5725  ;;  %v3207_v42 = vmul.f32 %v5724_v36, %v3079_v25  ;;  %5745 = vrcp.f32 %v2705_v34  ;;  %v5295_v43 = vpop.f32.mrb[52].mxu1 }
 0x271   : > { %v5728_v44 = vpop.eup %5727  ;;  %v3210_v45 = vmul.f32 %v5726_v41, %v3082_v29  ;;  %5747 = vpow2.f32 %v4223_v31  ;;  %v4229_v46 = vmul.f32 -1.442695, %v5295_v43  ;;  %v1972_v47 = vpop.f32.mrb[53].mxu1  ;;  %v3087_v29 = vunpack.c.l.bf16 %v6094_v28 }
 0x272   : > { %v5730_v48 = vpop.eup %5729  ;;  %v3208_v49 = vmul.f32 %v5728_v44, %v3080_v33  ;;  %5749 = vpow2.f32 %v4226_v35  ;;  %v4227_v50 = vmul.f32 -1.442695, %v1972_v47  ;;  %v5296_v51 = vpop.f32.mrb[54].mxu1  ;;  %v3088_v35 = vunpack.c.h.bf16 %v6094_v28 }
 0x273   : > { %v5732_v52 = vpop.eup %5731  ;;  %v4664_v53 = vpack.c.bf16 %v3210_v45, %v3209_v39  ;;  %v3213_v54 = vmul.f32 %v5730_v48, %v3085_v38  ;;  %5751 = vpow2.f32 %v4224_v40  ;;  %v1975_v55 = vpop.f32.mrb[55].mxu1  ;;  %v4230_v3 = vmul.f32 -1.442695, %v5296_v51  ;;  %v6095_v39 = vld [vmem:[%s6369_s11 + $0xc8] sm:$0xff]  }
 0x274   : > { %v5734_v56 = vpop.eup %5733  ;;  %v4659_v59 = vpack.c.bf16 %v3208_v49, %v3207_v42  ;;  %v2703_v60 = vadd.f32 1.0, %v5732_v52  ;;  %5753 = vpow2.f32 %v4229_v46  ;;  %v4228_v8 = vmul.f32 -1.442695, %v1975_v55 }
 0x275   : > { %v5736_v61 = vpop.eup %5735  ;;  %4904 = vst [vmem:[%s6547_s26 + $0x98] sm:$0xff] %v4664_v53   ;;  %v2706_v63 = vadd.f32 1.0, %v5734_v56  ;;  %5755 = vpow2.f32 %v4227_v50  ;;  %v3093_v40 = vunpack.c.l.bf16 %v6095_v39 }
 0x276   : > { %v5738_v0 = vpop.eup %5737  ;;  %4903 = vst [vmem:[%s6547_s26 + $0x90] sm:$0xff] %v4659_v59   ;;  %5757 = vrcp.f32 %v2703_v60  ;;  %v2704_v2 = vadd.f32 1.0, %v5736_v61  ;;  %v6096_v59 = vld [vmem:[%s6369_s11 + $0xc0] sm:$0xff]  }
 0x277   : > { %v5740_v4 = vpop.eup %5739  ;;  %5759 = vrcp.f32 %v2706_v63  ;;  %v2709_v7 = vadd.f32 1.0, %v5738_v0  ;;  %v3091_v60 = vunpack.c.l.bf16 %v6096_v59  ;;  %v3094_v0 = vunpack.c.h.bf16 %v6095_v39  ;;  %v6099_v39 = vld [vmem:[%s6369_s11 + $0xe8] sm:$0xff]  }
 0x278   : > { %v5742_v9 = vpop.eup %5741  ;;  %v3211_v10 = vmul.f32 %v5740_v4, %v3083_v58  ;;  %5761 = vrcp.f32 %v2704_v2  ;;  %v5299_v11 = vpop.f32.mrb[56].mxu1 }
 0x279   : > { %v5744_v12 = vpop.eup %5743  ;;  %v3214_v13 = vmul.f32 %v5742_v9, %v3086_v62  ;;  %5763 = vrcp.f32 %v2709_v7  ;;  %v4233_v14 = vmul.f32 -1.442695, %v5299_v11  ;;  %v1988_v15 = vpop.f32.mrb[57].mxu1  ;;  %v6097_v7 = vld [vmem:[%s6369_s11 + $0xd8] sm:$0xff]  }
 0x27a   : > { %v5746_v16 = vpop.eup %5745  ;;  %v3212_v17 = vmul.f32 %v5744_v12, %v3084_v1  ;;  %5765 = vpow2.f32 %v4230_v3  ;;  %v4231_v18 = vmul.f32 -1.442695, %v1988_v15  ;;  %v5300_v19 = vpop.f32.mrb[58].mxu1  ;;  %v3092_v3 = vunpack.c.h.bf16 %v6096_v59 }
 0x27b   : > { %v5748_v20 = vpop.eup %5747  ;;  %v4674_v21 = vpack.c.bf16 %v3214_v13, %v3213_v54  ;;  %v3217_v22 = vmul.f32 %v5746_v16, %v3089_v6  ;;  %5767 = vpow2.f32 %v4228_v8  ;;  %v1991_v23 = vpop.f32.mrb[59].mxu1  ;;  %v4234_v37 = vmul.f32 -1.442695, %v5300_v19  ;;  %v6098_v13 = vld [vmem:[%s6369_s11 + $0xd0] sm:$0xff]  }
 0x27c   : > { %v5750_v24 = vpop.eup %5749  ;;  %v4669_v25 = vpack.c.bf16 %v3212_v17, %v3211_v10  ;;  %v2707_v26 = vadd.f32 1.0, %v5748_v20  ;;  %5769 = vpow2.f32 %v4233_v14  ;;  %v4232_v42 = vmul.f32 -1.442695, %v1991_v23 }
 0x27d   : > { %v5752_v27 = vpop.eup %5751  ;;  %4906 = vst [vmem:[%s6547_s26 + $0xa8] sm:$0xff] %v4674_v21   ;;  %v2710_v30 = vadd.f32 1.0, %v5750_v24  ;;  %5771 = vpow2.f32 %v4231_v18  ;;  %v3097_v8 = vunpack.c.l.bf16 %v6097_v7  ;;  %v3095_v14 = vunpack.c.l.bf16 %v6098_v13 }
 0x27e   : > { %v5754_v31 = vpop.eup %5753  ;;  %4905 = vst [vmem:[%s6547_s26 + $0xa0] sm:$0xff] %v4669_v25   ;;  %5773 = vrcp.f32 %v2707_v26  ;;  %v2708_v33 = vadd.f32 1.0, %v5752_v27 }
 0x27f   : > { %v5756_v34 = vpop.eup %5755  ;;  %5775 = vrcp.f32 %v2710_v30  ;;  %v2713_v36 = vadd.f32 1.0, %v5754_v31 }
 0x280   : > { %v5758_v38 = vpop.eup %5757  ;;  %5777 = vrcp.f32 %v2708_v33  ;;  %v2711_v41 = vadd.f32 1.0, %v5756_v34  ;;  %v5303_v43 = vpop.f32.mrb[60].mxu1  ;;  %v3098_v33 = vunpack.c.h.bf16 %v6097_v7 }
 0x281   : > { %v5760_v44 = vpop.eup %5759  ;;  %v3215_v45 = vmul.f32 %v5758_v38, %v3087_v29  ;;  %5779 = vrcp.f32 %v2713_v36  ;;  %v4237_v46 = vmul.f32 -1.442695, %v5303_v43  ;;  %v2004_v47 = vpop.f32.mrb[61].mxu1  ;;  %v3096_v36 = vunpack.c.h.bf16 %v6098_v13 }
 0x282   : > { %v5762_v48 = vpop.eup %5761  ;;  %v3218_v49 = vmul.f32 %v5760_v44, %v3090_v32  ;;  %5781 = vrcp.f32 %v2711_v41  ;;  %v4235_v50 = vmul.f32 -1.442695, %v2004_v47  ;;  %v5304_v51 = vpop.f32.mrb[62].mxu1 }
 0x283   : > { %v5764_v52 = vpop.eup %5763  ;;  %v3216_v53 = vmul.f32 %v5762_v48, %v3088_v35  ;;  %5783 = vpow2.f32 %v4234_v37  ;;  %v2007_v54 = vpop.f32.mrb[63].mxu1  ;;  %v4238_v5 = vmul.f32 -1.442695, %v5304_v51 }
 0x284   : > { %v5766_v55 = vpop.eup %5765  ;;  %v4684_v56 = vpack.c.bf16 %v3218_v49, %v3217_v22  ;;  %v3221_v57 = vmul.f32 %v5764_v52, %v3093_v40  ;;  %5785 = vpow2.f32 %v4232_v42  ;;  %v4236_v10 = vmul.f32 -1.442695, %v2007_v54 }
 0x285   : > { %v5768_v58 = vpop.eup %5767  ;;  %v4679_v61 = vpack.c.bf16 %v3216_v53, %v3215_v45  ;;  %v2714_v62 = vadd.f32 1.0, %v5766_v55  ;;  %5787 = vpow2.f32 %v4237_v46  ;;  %v3101_v40 = vunpack.c.l.bf16 %v6099_v39  ;;  %v6100_v45 = vld [vmem:[%s6369_s11 + $0xe0] sm:$0xff]  }
 0x286   : > { %v5770_v63 = vpop.eup %5769  ;;  %4908 = vst [vmem:[%s6547_s26 + $0xb8] sm:$0xff] %v4684_v56   ;;  %v2712_v1 = vadd.f32 1.0, %v5768_v58  ;;  %5789 = vpow2.f32 %v4235_v50  ;;  %v3099_v46 = vunpack.c.l.bf16 %v6100_v45 }
 0x287   : > { %v5772_v2 = vpop.eup %5771  ;;  %4907 = vst [vmem:[%s6547_s26 + $0xb0] sm:$0xff] %v4679_v61   ;;  %5791 = vrcp.f32 %v2714_v62  ;;  %v2717_v4 = vadd.f32 1.0, %v5770_v63 }
 0x288   : > { %v5774_v6 = vpop.eup %5773  ;;  %5793 = vrcp.f32 %v2712_v1  ;;  %v2715_v9 = vadd.f32 1.0, %v5772_v2  ;;  %v5307_v11 = vpop.f32.mrb[64].mxu1 }
 0x289   : > { %v5776_v12 = vpop.eup %5775  ;;  %v3219_v15 = vmul.f32 %v5774_v6, %v3091_v60  ;;  %5795 = vrcp.f32 %v2717_v4  ;;  %v4241_v16 = vmul.f32 -1.442695, %v5307_v11  ;;  %v2020_v17 = vpop.f32.mrb[65].mxu1  ;;  %v3100_v6 = vunpack.c.h.bf16 %v6100_v45 }
 0x28a   : > { %v5778_v18 = vpop.eup %5777  ;;  %v3222_v19 = vmul.f32 %v5776_v12, %v3094_v0  ;;  %5797 = vrcp.f32 %v2715_v9  ;;  %v4239_v20 = vmul.f32 -1.442695, %v2020_v17  ;;  %v5308_v21 = vpop.f32.mrb[66].mxu1 }
 0x28b   : > { %v5780_v22 = vpop.eup %5779  ;;  %v3220_v23 = vmul.f32 %v5778_v18, %v3092_v3  ;;  %5799 = vpow2.f32 %v4238_v5  ;;  %v4242_v24 = vmul.f32 -1.442695, %v5308_v21  ;;  %v2023_v25 = vpop.f32.mrb[67].mxu1  ;;  %v3102_v3 = vunpack.c.h.bf16 %v6099_v39 }
 0x28c   : > { %v5782_v26 = vpop.eup %5781  ;;  %v4694_v27 = vpack.c.bf16 %v3222_v19, %v3221_v57  ;;  %v3225_v28 = vmul.f32 %v5780_v22, %v3097_v8  ;;  %5801 = vpow2.f32 %v4236_v10  ;;  %v4240_v42 = vmul.f32 -1.442695, %v2023_v25  ;;  %v6101_v10 = vld [vmem:[%s6369_s11 + $0xf8] sm:$0xff]  }
 0x28d   : > { %v5784_v29 = vpop.eup %5783  ;;  %v4689_v30 = vpack.c.bf16 %v3220_v23, %v3219_v15  ;;  %v3223_v31 = vmul.f32 %v5782_v26, %v3095_v14  ;;  %5803 = vpow2.f32 %v4241_v16  ;;  %v3105_v11 = vunpack.c.l.bf16 %v6101_v10  ;;  %v6102_v16 = vld [vmem:[%s6369_s11 + $0xf0] sm:$0xff]  }
 0x28e   : > { %v5786_v32 = vpop.eup %5785  ;;  %4910 = vst [vmem:[%s6547_s26 + $0xc8] sm:$0xff] %v4694_v27   ;;  %v2718_v34 = vadd.f32 1.0, %v5784_v29  ;;  %5805 = vpow2.f32 %v4239_v20  ;;  %v3103_v17 = vunpack.c.l.bf16 %v6102_v16 }
 0x28f   : > { %v5788_v35 = vpop.eup %5787  ;;  %4909 = vst [vmem:[%s6547_s26 + $0xc0] sm:$0xff] %v4689_v30   ;;  %v2716_v37 = vadd.f32 1.0, %v5786_v32  ;;  %5807 = vpow2.f32 %v4242_v24 }
 0x290   : > { %v5790_v38 = vpop.eup %5789  ;;  %5809 = vrcp.f32 %v2718_v34  ;;  %v2721_v41 = vadd.f32 1.0, %v5788_v35  ;;  %v5311_v43 = vpop.f32.mrb[68].mxu1  ;;  %v3106_v35 = vunpack.c.h.bf16 %v6101_v10 }
 0x291   : > { %v5792_v44 = vpop.eup %5791  ;;  %5811 = vrcp.f32 %v2716_v37  ;;  %v2719_v47 = vadd.f32 1.0, %v5790_v38  ;;  %v4245_v48 = vmul.f32 -1.442695, %v5311_v43  ;;  %v2036_v49 = vpop.f32.mrb[69].mxu1  ;;  %v3104_v38 = vunpack.c.h.bf16 %v6102_v16 }
 0x292   : > { %v5794_v50 = vpop.eup %5793  ;;  %v3226_v51 = vmul.f32 %v5792_v44, %v3098_v33  ;;  %5813 = vrcp.f32 %v2721_v41  ;;  %v4243_v52 = vmul.f32 -1.442695, %v2036_v49  ;;  %v5312_v53 = vpop.f32.mrb[70].mxu1 }
 0x293   : > { %v5796_v54 = vpop.eup %5795  ;;  %v3224_v55 = vmul.f32 %v5794_v50, %v3096_v36  ;;  %5815 = vrcp.f32 %v2719_v47  ;;  %v4246_v56 = vmul.f32 -1.442695, %v5312_v53  ;;  %v2039_v57 = vpop.f32.mrb[71].mxu1 }
 0x294   : > { %v5798_v58 = vpop.eup %5797  ;;  %v4704_v59 = vpack.c.bf16 %v3226_v51, %v3225_v28  ;;  %v3229_v60 = vmul.f32 %v5796_v54, %v3101_v40  ;;  %5817 = vpow2.f32 %v4240_v42  ;;  %v4244_v13 = vmul.f32 -1.442695, %v2039_v57  ;;  %v6103_v42 = vld [vmem:[%s6369_s11 + $0x108] sm:$0xff]  }
 0x295   : > { %v5800_v61 = vpop.eup %5799  ;;  %v4699_v62 = vpack.c.bf16 %v3224_v55, %v3223_v31  ;;  %v3227_v63 = vmul.f32 %v5798_v58, %v3099_v46  ;;  %5819 = vpow2.f32 %v4245_v48  ;;  %v3109_v43 = vunpack.c.l.bf16 %v6103_v42  ;;  %v6104_v48 = vld [vmem:[%s6369_s11 + $0x100] sm:$0xff]  }
 0x296   : > { %v5802_v0 = vpop.eup %5801  ;;  %4912 = vst [vmem:[%s6547_s26 + $0xd8] sm:$0xff] %v4704_v59   ;;  %v2722_v1 = vadd.f32 1.0, %v5800_v61  ;;  %5821 = vpow2.f32 %v4243_v52  ;;  %v3107_v49 = vunpack.c.l.bf16 %v6104_v48  ;;  %v3110_v54 = vunpack.c.h.bf16 %v6103_v42 }
 0x297   : > { %v5804_v2 = vpop.eup %5803  ;;  %4911 = vst [vmem:[%s6547_s26 + $0xd0] sm:$0xff] %v4699_v62   ;;  %v2720_v4 = vadd.f32 1.0, %v5802_v0  ;;  %5823 = vpow2.f32 %v4246_v56 }
 0x298   : > { %v5806_v5 = vpop.eup %5805  ;;  %5825 = vrcp.f32 %v2722_v1  ;;  %v2725_v7 = vadd.f32 1.0, %v5804_v2  ;;  %v5315_v8 = vpop.f32.mrb[72].mxu1 }
 0x299   : > { %v5808_v9 = vpop.eup %5807  ;;  %5827 = vrcp.f32 %v2720_v4  ;;  %v2723_v12 = vadd.f32 1.0, %v5806_v5  ;;  %v2052_v14 = vpop.f32.mrb[73].mxu1  ;;  %v4249_v19 = vmul.f32 -1.442695, %v5315_v8 }
 0x29a   : > { %v5810_v15 = vpop.eup %5809  ;;  %5829 = vrcp.f32 %v2725_v7  ;;  %v2726_v18 = vadd.f32 1.0, %v5808_v9  ;;  %v5316_v20 = vpop.f32.mrb[74].mxu1  ;;  %v4247_v23 = vmul.f32 -1.442695, %v2052_v14  ;;  %v3108_v7 = vunpack.c.h.bf16 %v6104_v48 }
 0x29b   : > { %v5812_v21 = vpop.eup %5811  ;;  %v3230_v22 = vmul.f32 %v5810_v15, %v3102_v3  ;;  %5831 = vrcp.f32 %v2723_v12  ;;  %v2055_v24 = vpop.f32.mrb[75].mxu1  ;;  %v4250_v27 = vmul.f32 -1.442695, %v5316_v20 }
 0x29c   : > { %v5814_v25 = vpop.eup %5813  ;;  %v3228_v26 = vmul.f32 %v5812_v21, %v3100_v6  ;;  %5833 = vrcp.f32 %v2726_v18  ;;  %v4248_v45 = vmul.f32 -1.442695, %v2055_v24 }
 0x29d   : > { %v5816_v28 = vpop.eup %5815  ;;  %v4714_v29 = vpack.c.bf16 %v3230_v22, %v3229_v60  ;;  %v3233_v30 = vmul.f32 %v5814_v25, %v3105_v11  ;;  %5835 = vpow2.f32 %v4244_v13  ;;  %v6105_v11 = vld [vmem:[%s6369_s11 + $0x118] sm:$0xff]  }
 0x29e   : > { %v5818_v31 = vpop.eup %5817  ;;  %v4709_v32 = vpack.c.bf16 %v3228_v26, %v3227_v63  ;;  %v3231_v33 = vmul.f32 %v5816_v28, %v3103_v17  ;;  %5837 = vpow2.f32 %v4249_v19  ;;  %v3113_v12 = vunpack.c.l.bf16 %v6105_v11  ;;  %v6106_v17 = vld [vmem:[%s6369_s11 + $0x110] sm:$0xff]  }
 0x29f   : > { %v5820_v34 = vpop.eup %5819  ;;  %4914 = vst [vmem:[%s6547_s26 + $0xe8] sm:$0xff] %v4714_v29   ;;  %v2724_v36 = vadd.f32 1.0, %v5818_v31  ;;  %5839 = vpow2.f32 %v4247_v23  ;;  %v3111_v18 = vunpack.c.l.bf16 %v6106_v17  ;;  %v3114_v23 = vunpack.c.h.bf16 %v6105_v11 }
 0x2a0   : > { %v5822_v37 = vpop.eup %5821  ;;  %4913 = vst [vmem:[%s6547_s26 + $0xe0] sm:$0xff] %v4709_v32   ;;  %v2729_v39 = vadd.f32 1.0, %v5820_v34  ;;  %5841 = vpow2.f32 %v4250_v27  ;;  %v5319_v40 = vpop.f32.mrb[76].mxu1  ;;  %v3112_v42 = vunpack.c.h.bf16 %v6106_v17 }
 0x2a1   : > { %v5824_v41 = vpop.eup %5823  ;;  %5843 = vrcp.f32 %v2724_v36  ;;  %v2727_v44 = vadd.f32 1.0, %v5822_v37  ;;  %v2068_v46 = vpop.f32.mrb[77].mxu1  ;;  %v4253_v51 = vmul.f32 -1.442695, %v5319_v40 }
 0x2a2   : > { %v5826_v47 = vpop.eup %5825  ;;  %5845 = vrcp.f32 %v2729_v39  ;;  %v2730_v50 = vadd.f32 1.0, %v5824_v41  ;;  %v5320_v52 = vpop.f32.mrb[78].mxu1  ;;  %v4251_v56 = vmul.f32 -1.442695, %v2068_v46 }
 0x2a3   : > { %v5828_v53 = vpop.eup %5827  ;;  %v3234_v55 = vmul.f32 %v5826_v47, %v3106_v35  ;;  %5847 = vrcp.f32 %v2727_v44  ;;  %v2071_v57 = vpop.f32.mrb[79].mxu1  ;;  %v4254_v60 = vmul.f32 -1.442695, %v5320_v52  ;;  %v6107_v47 = vld [vmem:[%s6369_s11 + $0x128] sm:$0xff]   ;;  %v6108_v52 = vld [vmem:[%s6369_s11 + $0x120] sm:$0xff]  }
 0x2a4   : > { %v5830_v58 = vpop.eup %5829  ;;  %v3232_v59 = vmul.f32 %v5828_v53, %v3104_v38  ;;  %5849 = vrcp.f32 %v2730_v50  ;;  %v4252_v0 = vmul.f32 -1.442695, %v2071_v57  ;;  %v3117_v48 = vunpack.c.l.bf16 %v6107_v47 }
 0x2a5   : > { %v5832_v61 = vpop.eup %5831  ;;  %v4724_v62 = vpack.c.bf16 %v3234_v55, %v3233_v30  ;;  %v3237_v63 = vmul.f32 %v5830_v58, %v3109_v43  ;;  %5851 = vpow2.f32 %v4248_v45  ;;  %v3115_v53 = vunpack.c.l.bf16 %v6108_v52 }
 0x2a6   : > { %v5834_v1 = vpop.eup %5833  ;;  %v4719_v2 = vpack.c.bf16 %v3232_v59, %v3231_v33  ;;  %v3235_v3 = vmul.f32 %v5832_v61, %v3107_v49  ;;  %5853 = vpow2.f32 %v4253_v51  ;;  %v3118_v58 = vunpack.c.h.bf16 %v6107_v47  ;;  %v6111_v47 = vld [vmem:[%s6369_s11 + $0x148] sm:$0xff]  }
 0x2a7   : > { %v5836_v4 = vpop.eup %5835  ;;  %4916 = vst [vmem:[%s6547_s26 + $0xf8] sm:$0xff] %v4724_v62   ;;  %v3238_v5 = vmul.f32 %v5834_v1, %v3110_v54  ;;  %5855 = vpow2.f32 %v4251_v56 }
 0x2a8   : > { %v5838_v6 = vpop.eup %5837  ;;  %4915 = vst [vmem:[%s6547_s26 + $0xf0] sm:$0xff] %v4719_v2   ;;  %v2728_v8 = vadd.f32 1.0, %v5836_v4  ;;  %5857 = vpow2.f32 %v4254_v60  ;;  %v5323_v9 = vpop.f32.mrb[80].mxu1 }
 0x2a9   : > { %v5840_v10 = vpop.eup %5839  ;;  %v4734_v13 = vpack.c.bf16 %v3238_v5, %v3237_v63  ;;  %v2733_v14 = vadd.f32 1.0, %v5838_v6  ;;  %5859 = vpow2.f32 %v4252_v0  ;;  %v2084_v15 = vpop.f32.mrb[81].mxu1  ;;  %v4257_v20 = vmul.f32 -1.442695, %v5323_v9 }
 0x2aa   : > { %v5842_v16 = vpop.eup %5841  ;;  %5861 = vrcp.f32 %v2728_v8  ;;  %v2731_v19 = vadd.f32 1.0, %v5840_v10  ;;  %v5324_v21 = vpop.f32.mrb[82].mxu1  ;;  %v4255_v25 = vmul.f32 -1.442695, %v2084_v15  ;;  %v3116_v10 = vunpack.c.h.bf16 %v6108_v52 }
 0x2ab   : > { %v5844_v22 = vpop.eup %5843  ;;  %4918 = vst [vmem:[%s6547_s26 + $0x108] sm:$0xff] %v4734_v13   ;;  %5863 = vrcp.f32 %v2733_v14  ;;  %v2734_v24 = vadd.f32 1.0, %v5842_v16  ;;  %v2087_v26 = vpop.f32.mrb[83].mxu1  ;;  %v4258_v29 = vmul.f32 -1.442695, %v5324_v21  ;;  %v6109_v14 = vld [vmem:[%s6369_s11 + $0x138] sm:$0xff]  }
 0x2ac   : > { %v5846_v27 = vpop.eup %5845  ;;  %v3236_v28 = vmul.f32 %v5844_v22, %v3108_v7  ;;  %5865 = vrcp.f32 %v2731_v19  ;;  %v4256_v32 = vmul.f32 -1.442695, %v2087_v26  ;;  %v3121_v15 = vunpack.c.l.bf16 %v6109_v14 }
 0x2ad   : > { %v5848_v30 = vpop.eup %5847  ;;  %v3241_v31 = vmul.f32 %v5846_v27, %v3113_v12  ;;  %5867 = vrcp.f32 %v2734_v24  ;;  %v3122_v26 = vunpack.c.h.bf16 %v6109_v14 }
 0x2ae   : > { %v5850_v33 = vpop.eup %5849  ;;  %v4729_v34 = vpack.c.bf16 %v3236_v28, %v3235_v3  ;;  %v3239_v35 = vmul.f32 %v5848_v30, %v3111_v18  ;;  %5869 = vpow2.f32 %v4257_v20  ;;  %v6110_v20 = vld [vmem:[%s6369_s11 + $0x130] sm:$0xff]  }
 0x2af   : > { %v5852_v36 = vpop.eup %5851  ;;  %v3242_v37 = vmul.f32 %v5850_v33, %v3114_v23  ;;  %5871 = vpow2.f32 %v4255_v25  ;;  %v3119_v21 = vunpack.c.l.bf16 %v6110_v20  ;;  %v3120_v30 = vunpack.c.h.bf16 %v6110_v20 }
 0x2b0   : > { %v5854_v38 = vpop.eup %5853  ;;  %4917 = vst [vmem:[%s6547_s26 + $0x100] sm:$0xff] %v4729_v34   ;;  %v2732_v39 = vadd.f32 1.0, %v5852_v36  ;;  %5873 = vpow2.f32 %v4258_v29  ;;  %v5327_v40 = vpop.f32.mrb[84].mxu1 }
 0x2b1   : > { %v5856_v41 = vpop.eup %5855  ;;  %v4744_v43 = vpack.c.bf16 %v3242_v37, %v3241_v31  ;;  %v2737_v44 = vadd.f32 1.0, %v5854_v38  ;;  %5875 = vpow2.f32 %v4256_v32  ;;  %v2100_v45 = vpop.f32.mrb[85].mxu1  ;;  %v4261_v55 = vmul.f32 -1.442695, %v5327_v40 }
 0x2b2   : > { %v5858_v46 = vpop.eup %5857  ;;  %5877 = vrcp.f32 %v2732_v39  ;;  %v2735_v49 = vadd.f32 1.0, %v5856_v41  ;;  %v5328_v50 = vpop.f32.mrb[86].mxu1  ;;  %v4259_v60 = vmul.f32 -1.442695, %v2100_v45 }
 0x2b3   : > { %v5860_v51 = vpop.eup %5859  ;;  %4920 = vst [vmem:[%s6547_s26 + $0x118] sm:$0xff] %v4744_v43   ;;  %5879 = vrcp.f32 %v2737_v44  ;;  %v2738_v54 = vadd.f32 1.0, %v5858_v46  ;;  %v2103_v56 = vpop.f32.mrb[87].mxu1  ;;  %v4262_v63 = vmul.f32 -1.442695, %v5328_v50 }
 0x2b4   : > { %v5862_v57 = vpop.eup %5861  ;;  %5881 = vrcp.f32 %v2735_v49  ;;  %v2736_v59 = vadd.f32 1.0, %v5860_v51  ;;  %v4260_v2 = vmul.f32 -1.442695, %v2103_v56 }
 0x2b5   : > { %v5864_v61 = vpop.eup %5863  ;;  %v3240_v62 = vmul.f32 %v5862_v57, %v3112_v42  ;;  %5883 = vrcp.f32 %v2738_v54 }
 0x2b6   : > { %v5866_v0 = vpop.eup %5865  ;;  %v3245_v1 = vmul.f32 %v5864_v61, %v3117_v48  ;;  %5885 = vrcp.f32 %v2736_v59  ;;  %v3125_v48 = vunpack.c.l.bf16 %v6111_v47  ;;  %v3126_v59 = vunpack.c.h.bf16 %v6111_v47 }
 0x2b7   : > { %v5868_v3 = vpop.eup %5867  ;;  %v4739_v4 = vpack.c.bf16 %v3240_v62, %v3239_v35  ;;  %v3243_v5 = vmul.f32 %v5866_v0, %v3115_v53  ;;  %5887 = vpow2.f32 %v4261_v55  ;;  %v6112_v53 = vld [vmem:[%s6369_s11 + $0x140] sm:$0xff]  }
 0x2b8   : > { %v5870_v6 = vpop.eup %5869  ;;  %v3246_v7 = vmul.f32 %v5868_v3, %v3118_v58  ;;  %5889 = vpow2.f32 %v4259_v60  ;;  %v5331_v8 = vpop.f32.mrb[88].mxu1  ;;  %v3123_v54 = vunpack.c.l.bf16 %v6112_v53 }
 0x2b9   : > { %v5872_v9 = vpop.eup %5871  ;;  %4919 = vst [vmem:[%s6547_s26 + $0x110] sm:$0xff] %v4739_v4   ;;  %v2741_v11 = vadd.f32 1.0, %v5870_v6  ;;  %5891 = vpow2.f32 %v4262_v63  ;;  %v2116_v12 = vpop.f32.mrb[89].mxu1  ;;  %v4265_v23 = vmul.f32 -1.442695, %v5331_v8  ;;  %v3124_v63 = vunpack.c.h.bf16 %v6112_v53 }
 0x2ba   : > { %v5874_v13 = vpop.eup %5873  ;;  %v4754_v16 = vpack.c.bf16 %v3246_v7, %v3245_v1  ;;  %v2739_v17 = vadd.f32 1.0, %v5872_v9  ;;  %5893 = vpow2.f32 %v4260_v2  ;;  %v5332_v18 = vpop.f32.mrb[90].mxu1  ;;  %v4263_v28 = vmul.f32 -1.442695, %v2116_v12 }
 0x2bb   : > { %v5876_v19 = vpop.eup %5875  ;;  %5895 = vrcp.f32 %v2741_v11  ;;  %v2742_v22 = vadd.f32 1.0, %v5874_v13  ;;  %v2119_v24 = vpop.f32.mrb[91].mxu1  ;;  %v4266_v32 = vmul.f32 -1.442695, %v5332_v18 }
 0x2bc   : > { %v5878_v25 = vpop.eup %5877  ;;  %4922 = vst [vmem:[%s6547_s26 + $0x128] sm:$0xff] %v4754_v16   ;;  %5897 = vrcp.f32 %v2739_v17  ;;  %v2740_v27 = vadd.f32 1.0, %v5876_v19  ;;  %v4264_v35 = vmul.f32 -1.442695, %v2119_v24  ;;  %v6113_v19 = vld [vmem:[%s6369_s11 + $0x158] sm:$0xff]  }
 0x2bd   : > { %v5880_v29 = vpop.eup %5879  ;;  %v3244_v31 = vmul.f32 %v5878_v25, %v3116_v10  ;;  %5899 = vrcp.f32 %v2742_v22  ;;  %v3129_v20 = vunpack.c.l.bf16 %v6113_v19  ;;  %v6114_v25 = vld [vmem:[%s6369_s11 + $0x150] sm:$0xff]  }
 0x2be   : > { %v5882_v33 = vpop.eup %5881  ;;  %v3249_v34 = vmul.f32 %v5880_v29, %v3121_v15  ;;  %5901 = vrcp.f32 %v2740_v27  ;;  %v3130_v29 = vunpack.c.h.bf16 %v6113_v19 }
 0x2bf   : > { %v5884_v36 = vpop.eup %5883  ;;  %v4749_v37 = vpack.c.bf16 %v3244_v31, %v3243_v5  ;;  %v3247_v38 = vmul.f32 %v5882_v33, %v3119_v21  ;;  %5903 = vpow2.f32 %v4265_v23  ;;  %v3128_v33 = vunpack.c.h.bf16 %v6114_v25 }
 0x2c0   : > { %v5886_v39 = vpop.eup %5885  ;;  %v3250_v40 = vmul.f32 %v5884_v36, %v3122_v26  ;;  %5905 = vpow2.f32 %v4263_v28  ;;  %v5335_v41 = vpop.f32.mrb[92].mxu1  ;;  %v3127_v26 = vunpack.c.l.bf16 %v6114_v25  ;;  %v6118_v25 = vld [vmem:[%s6369_s11 + $0x170] sm:$0xff]  }
 0x2c1   : > { %v5888_v42 = vpop.eup %5887  ;;  %4921 = vst [vmem:[%s6547_s26 + $0x120] sm:$0xff] %v4749_v37   ;;  %v3248_v43 = vmul.f32 %v5886_v39, %v3120_v30  ;;  %5907 = vpow2.f32 %v4266_v32  ;;  %v4269_v44 = vmul.f32 -1.442695, %v5335_v41  ;;  %v2132_v45 = vpop.f32.mrb[93].mxu1 }
 0x2c2   : > { %v5890_v46 = vpop.eup %5889  ;;  %v4764_v49 = vpack.c.bf16 %v3250_v40, %v3249_v34  ;;  %v2745_v50 = vadd.f32 1.0, %v5888_v42  ;;  %5909 = vpow2.f32 %v4264_v35  ;;  %v5336_v51 = vpop.f32.mrb[94].mxu1  ;;  %v4267_v61 = vmul.f32 -1.442695, %v2132_v45 }
 0x2c3   : > { %v5892_v52 = vpop.eup %5891  ;;  %v4759_v55 = vpack.c.bf16 %v3248_v43, %v3247_v38  ;;  %v2743_v56 = vadd.f32 1.0, %v5890_v46  ;;  %5911 = vpow2.f32 %v4269_v44  ;;  %v2135_v57 = vpop.f32.mrb[95].mxu1  ;;  %v4270_v1 = vmul.f32 -1.442695, %v5336_v51 }
 0x2c4   : > { %v5894_v58 = vpop.eup %5893  ;;  %4924 = vst [vmem:[%s6547_s26 + $0x138] sm:$0xff] %v4764_v49   ;;  %5913 = vrcp.f32 %v2745_v50  ;;  %v2746_v60 = vadd.f32 1.0, %v5892_v52  ;;  %v4268_v4 = vmul.f32 -1.442695, %v2135_v57  ;;  %v6115_v50 = vld [vmem:[%s6369_s11 + $0x168] sm:$0xff]  }
 0x2c5   : > { %v5896_v62 = vpop.eup %5895  ;;  %4923 = vst [vmem:[%s6547_s26 + $0x130] sm:$0xff] %v4759_v55   ;;  %5915 = vrcp.f32 %v2743_v56  ;;  %v2744_v0 = vadd.f32 1.0, %v5894_v58  ;;  %v3133_v51 = vunpack.c.l.bf16 %v6115_v50  ;;  %v6116_v56 = vld [vmem:[%s6369_s11 + $0x160] sm:$0xff]  }
 0x2c6   : > { %v5898_v2 = vpop.eup %5897  ;;  %v3253_v3 = vmul.f32 %v5896_v62, %v3125_v48  ;;  %5917 = vrcp.f32 %v2746_v60  ;;  %v3131_v57 = vunpack.c.l.bf16 %v6116_v56 }
 0x2c7   : > { %v5900_v5 = vpop.eup %5899  ;;  %v3251_v6 = vmul.f32 %v5898_v2, %v3123_v54  ;;  %5919 = vrcp.f32 %v2744_v0 }
 0x2c8   : > { %v5902_v7 = vpop.eup %5901  ;;  %v3254_v8 = vmul.f32 %v5900_v5, %v3126_v59  ;;  %5921 = vpow2.f32 %v4267_v61  ;;  %v5339_v9 = vpop.f32.mrb[96].mxu1  ;;  %v3134_v61 = vunpack.c.h.bf16 %v6115_v50  ;;  %v6117_v5 = vld [vmem:[%s6369_s11 + $0x178] sm:$0xff]  }
 0x2c9   : > { %v5904_v10 = vpop.eup %5903  ;;  %v3252_v11 = vmul.f32 %v5902_v7, %v3124_v63  ;;  %5923 = vpow2.f32 %v4270_v1  ;;  %v4273_v12 = vmul.f32 -1.442695, %v5339_v9  ;;  %v2148_v13 = vpop.f32.mrb[97].mxu1  ;;  %v3132_v1 = vunpack.c.h.bf16 %v6116_v56 }
 0x2ca   : > { %v5906_v14 = vpop.eup %5905  ;;  %v4774_v15 = vpack.c.bf16 %v3254_v8, %v3253_v3  ;;  %v2749_v16 = vadd.f32 1.0, %v5904_v10  ;;  %5925 = vpow2.f32 %v4268_v4  ;;  %v5340_v17 = vpop.f32.mrb[98].mxu1  ;;  %v4271_v31 = vmul.f32 -1.442695, %v2148_v13 }
 0x2cb   : > { %v5908_v18 = vpop.eup %5907  ;;  %v4769_v21 = vpack.c.bf16 %v3252_v11, %v3251_v6  ;;  %v2747_v22 = vadd.f32 1.0, %v5906_v14  ;;  %5927 = vpow2.f32 %v4273_v12  ;;  %v2151_v23 = vpop.f32.mrb[99].mxu1  ;;  %v4274_v35 = vmul.f32 -1.442695, %v5340_v17 }
 0x2cc   : > { %v5910_v24 = vpop.eup %5909  ;;  %4926 = vst [vmem:[%s6547_s26 + $0x148] sm:$0xff] %v4774_v15   ;;  %5929 = vrcp.f32 %v2749_v16  ;;  %v2750_v27 = vadd.f32 1.0, %v5908_v18  ;;  %v4272_v38 = vmul.f32 -1.442695, %v2151_v23  ;;  %v3137_v6 = vunpack.c.l.bf16 %v6117_v5 }
 0x2cd   : > { %v5912_v28 = vpop.eup %5911  ;;  %4925 = vst [vmem:[%s6547_s26 + $0x140] sm:$0xff] %v4769_v21   ;;  %5931 = vrcp.f32 %v2747_v22  ;;  %v2748_v30 = vadd.f32 1.0, %v5910_v24 }
 0x2ce   : > { %v5914_v32 = vpop.eup %5913  ;;  %5933 = vrcp.f32 %v2750_v27  ;;  %v2753_v34 = vadd.f32 1.0, %v5912_v28 }
 0x2cf   : > { %v5916_v36 = vpop.eup %5915  ;;  %v3257_v37 = vmul.f32 %v5914_v32, %v3129_v20  ;;  %5935 = vrcp.f32 %v2748_v30  ;;  %v3138_v30 = vunpack.c.h.bf16 %v6117_v5 }
 0x2d0   : > { %v5918_v39 = vpop.eup %5917  ;;  %v3255_v40 = vmul.f32 %v5916_v36, %v3127_v26  ;;  %5937 = vrcp.f32 %v2753_v34  ;;  %v5343_v41 = vpop.f32.mrb[100].mxu1  ;;  %v3135_v26 = vunpack.c.l.bf16 %v6118_v25 }
 0x2d1   : > { %v5920_v42 = vpop.eup %5919  ;;  %v3258_v43 = vmul.f32 %v5918_v39, %v3130_v29  ;;  %5939 = vpow2.f32 %v4271_v31  ;;  %v4277_v44 = vmul.f32 -1.442695, %v5343_v41  ;;  %v2164_v45 = vpop.f32.mrb[101].mxu1 }
 0x2d2   : > { %v5922_v46 = vpop.eup %5921  ;;  %v3256_v47 = vmul.f32 %v5920_v42, %v3128_v33  ;;  %5941 = vpow2.f32 %v4274_v35  ;;  %v5344_v48 = vpop.f32.mrb[102].mxu1  ;;  %v4275_v63 = vmul.f32 -1.442695, %v2164_v45  ;;  %v3136_v33 = vunpack.c.h.bf16 %v6118_v25 }
 0x2d3   : > { %v5924_v49 = vpop.eup %5923  ;;  %v4784_v52 = vpack.c.bf16 %v3258_v43, %v3257_v37  ;;  %v2751_v53 = vadd.f32 1.0, %v5922_v46  ;;  %5943 = vpow2.f32 %v4272_v38  ;;  %v2167_v54 = vpop.f32.mrb[103].mxu1  ;;  %v4278_v3 = vmul.f32 -1.442695, %v5344_v48  ;;  %v6119_v37 = vld [vmem:[%s6369_s11 + $0x188] sm:$0xff]  }
 0x2d4   : > { %v5926_v55 = vpop.eup %5925  ;;  %v4779_v58 = vpack.c.bf16 %v3256_v47, %v3255_v40  ;;  %v2754_v59 = vadd.f32 1.0, %v5924_v49  ;;  %5945 = vpow2.f32 %v4277_v44  ;;  %v4276_v8 = vmul.f32 -1.442695, %v2167_v54 }
 0x2d5   : > { %v5928_v60 = vpop.eup %5927  ;;  %4928 = vst [vmem:[%s6547_s26 + $0x158] sm:$0xff] %v4784_v52   ;;  %5947 = vrcp.f32 %v2751_v53  ;;  %v2752_v62 = vadd.f32 1.0, %v5926_v55  ;;  %v3141_v38 = vunpack.c.l.bf16 %v6119_v37 }
 0x2d6   : > { %v5930_v0 = vpop.eup %5929  ;;  %4927 = vst [vmem:[%s6547_s26 + $0x150] sm:$0xff] %v4779_v58   ;;  %5949 = vrcp.f32 %v2754_v59  ;;  %v2757_v2 = vadd.f32 1.0, %v5928_v60  ;;  %v6120_v60 = vld [vmem:[%s6369_s11 + $0x180] sm:$0xff]  }
 0x2d7   : > { %v5932_v4 = vpop.eup %5931  ;;  %v3261_v7 = vmul.f32 %v5930_v0, %v3133_v51  ;;  %5951 = vrcp.f32 %v2752_v62  ;;  %v3142_v0 = vunpack.c.h.bf16 %v6119_v37 }
 0x2d8   : > { %v5934_v9 = vpop.eup %5933  ;;  %v3259_v10 = vmul.f32 %v5932_v4, %v3131_v57  ;;  %5953 = vrcp.f32 %v2757_v2  ;;  %v5347_v11 = vpop.f32.mrb[104].mxu1 }
 0x2d9   : > { %v5936_v12 = vpop.eup %5935  ;;  %v3262_v13 = vmul.f32 %v5934_v9, %v3134_v61  ;;  %5955 = vpow2.f32 %v4275_v63  ;;  %v4281_v14 = vmul.f32 -1.442695, %v5347_v11  ;;  %v2180_v15 = vpop.f32.mrb[105].mxu1  ;;  %v3139_v61 = vunpack.c.l.bf16 %v6120_v60 }
 0x2da   : > { %v5938_v16 = vpop.eup %5937  ;;  %v3260_v17 = vmul.f32 %v5936_v12, %v3132_v1  ;;  %5957 = vpow2.f32 %v4278_v3  ;;  %v4279_v18 = vmul.f32 -1.442695, %v2180_v15  ;;  %v5348_v19 = vpop.f32.mrb[106].mxu1  ;;  %v3140_v3 = vunpack.c.h.bf16 %v6120_v60 }
 0x2db   : > { %v5940_v20 = vpop.eup %5939  ;;  %v4794_v21 = vpack.c.bf16 %v3262_v13, %v3261_v7  ;;  %v3265_v22 = vmul.f32 %v5938_v16, %v3137_v6  ;;  %5959 = vpow2.f32 %v4276_v8  ;;  %v2183_v23 = vpop.f32.mrb[107].mxu1  ;;  %v4282_v35 = vmul.f32 -1.442695, %v5348_v19  ;;  %v6121_v7 = vld [vmem:[%s6369_s11 + $0x198] sm:$0xff]  }
 0x2dc   : > { %v5942_v24 = vpop.eup %5941  ;;  %v4789_v27 = vpack.c.bf16 %v3260_v17, %v3259_v10  ;;  %v2755_v28 = vadd.f32 1.0, %v5940_v20  ;;  %5961 = vpow2.f32 %v4281_v14  ;;  %v4280_v40 = vmul.f32 -1.442695, %v2183_v23 }
 0x2dd   : > { %v5944_v29 = vpop.eup %5943  ;;  %4930 = vst [vmem:[%s6547_s26 + $0x168] sm:$0xff] %v4794_v21   ;;  %v2758_v31 = vadd.f32 1.0, %v5942_v24  ;;  %5963 = vpow2.f32 %v4279_v18  ;;  %v3145_v8 = vunpack.c.l.bf16 %v6121_v7 }
 0x2de   : > { %v5946_v32 = vpop.eup %5945  ;;  %4929 = vst [vmem:[%s6547_s26 + $0x160] sm:$0xff] %v4789_v27   ;;  %5965 = vrcp.f32 %v2755_v28  ;;  %v2756_v34 = vadd.f32 1.0, %v5944_v29  ;;  %v6122_v27 = vld [vmem:[%s6369_s11 + $0x190] sm:$0xff]  }
 0x2df   : > { %v5948_v36 = vpop.eup %5947  ;;  %5967 = vrcp.f32 %v2758_v31  ;;  %v2761_v39 = vadd.f32 1.0, %v5946_v32  ;;  %v3143_v28 = vunpack.c.l.bf16 %v6122_v27  ;;  %v3146_v32 = vunpack.c.h.bf16 %v6121_v7  ;;  %v6125_v7 = vld [vmem:[%s6369_s11 + $0x1b8] sm:$0xff]  }
 0x2e0   : > { %v5950_v41 = vpop.eup %5949  ;;  %v3263_v42 = vmul.f32 %v5948_v36, %v3135_v26  ;;  %5969 = vrcp.f32 %v2756_v34  ;;  %v5351_v43 = vpop.f32.mrb[108].mxu1 }
 0x2e1   : > { %v5952_v44 = vpop.eup %5951  ;;  %v3266_v45 = vmul.f32 %v5950_v41, %v3138_v30  ;;  %5971 = vrcp.f32 %v2761_v39  ;;  %v4285_v46 = vmul.f32 -1.442695, %v5351_v43  ;;  %v2196_v47 = vpop.f32.mrb[109].mxu1  ;;  %v6123_v39 = vld [vmem:[%s6369_s11 + $0x1a8] sm:$0xff]  }
 0x2e2   : > { %v5954_v48 = vpop.eup %5953  ;;  %v3264_v49 = vmul.f32 %v5952_v44, %v3136_v33  ;;  %5973 = vpow2.f32 %v4282_v35  ;;  %v4283_v50 = vmul.f32 -1.442695, %v2196_v47  ;;  %v5352_v51 = vpop.f32.mrb[110].mxu1  ;;  %v3144_v35 = vunpack.c.h.bf16 %v6122_v27 }
 0x2e3   : > { %v5956_v52 = vpop.eup %5955  ;;  %v4804_v53 = vpack.c.bf16 %v3266_v45, %v3265_v22  ;;  %v3269_v54 = vmul.f32 %v5954_v48, %v3141_v38  ;;  %5975 = vpow2.f32 %v4280_v40  ;;  %v2199_v55 = vpop.f32.mrb[111].mxu1  ;;  %v4286_v5 = vmul.f32 -1.442695, %v5352_v51  ;;  %v6124_v45 = vld [vmem:[%s6369_s11 + $0x1a0] sm:$0xff]  }
 0x2e4   : > { %v5958_v56 = vpop.eup %5957  ;;  %v4799_v57 = vpack.c.bf16 %v3264_v49, %v3263_v42  ;;  %v2759_v58 = vadd.f32 1.0, %v5956_v52  ;;  %5977 = vpow2.f32 %v4285_v46  ;;  %v4284_v10 = vmul.f32 -1.442695, %v2199_v55 }
 0x2e5   : > { %v5960_v59 = vpop.eup %5959  ;;  %4932 = vst [vmem:[%s6547_s26 + $0x178] sm:$0xff] %v4804_v53   ;;  %v2762_v62 = vadd.f32 1.0, %v5958_v56  ;;  %5979 = vpow2.f32 %v4283_v50  ;;  %v3149_v40 = vunpack.c.l.bf16 %v6123_v39  ;;  %v3147_v46 = vunpack.c.l.bf16 %v6124_v45 }
 0x2e6   : > { %v5962_v63 = vpop.eup %5961  ;;  %4931 = vst [vmem:[%s6547_s26 + $0x170] sm:$0xff] %v4799_v57   ;;  %5981 = vrcp.f32 %v2759_v58  ;;  %v2760_v1 = vadd.f32 1.0, %v5960_v59 }
 0x2e7   : > { %v5964_v2 = vpop.eup %5963  ;;  %5983 = vrcp.f32 %v2762_v62  ;;  %v2765_v4 = vadd.f32 1.0, %v5962_v63 }
 0x2e8   : > { %v5966_v6 = vpop.eup %5965  ;;  %5985 = vrcp.f32 %v2760_v1  ;;  %v2763_v9 = vadd.f32 1.0, %v5964_v2  ;;  %v5355_v11 = vpop.f32.mrb[112].mxu1  ;;  %v3150_v1 = vunpack.c.h.bf16 %v6123_v39 }
 0x2e9   : > { %v5968_v12 = vpop.eup %5967  ;;  %v3267_v13 = vmul.f32 %v5966_v6, %v3139_v61  ;;  %5987 = vrcp.f32 %v2765_v4  ;;  %v4289_v14 = vmul.f32 -1.442695, %v5355_v11  ;;  %v2212_v15 = vpop.f32.mrb[113].mxu1  ;;  %v3148_v4 = vunpack.c.h.bf16 %v6124_v45 }
 0x2ea   : > { %v5970_v16 = vpop.eup %5969  ;;  %v3270_v17 = vmul.f32 %v5968_v12, %v3142_v0  ;;  %5989 = vrcp.f32 %v2763_v9  ;;  %v4287_v18 = vmul.f32 -1.442695, %v2212_v15  ;;  %v5356_v19 = vpop.f32.mrb[114].mxu1 }
 0x2eb   : > { %v5972_v20 = vpop.eup %5971  ;;  %v3268_v21 = vmul.f32 %v5970_v16, %v3140_v3  ;;  %5991 = vpow2.f32 %v4286_v5  ;;  %v2215_v22 = vpop.f32.mrb[115].mxu1  ;;  %v4290_v37 = vmul.f32 -1.442695, %v5356_v19 }
 0x2ec   : > { %v5974_v23 = vpop.eup %5973  ;;  %v4814_v24 = vpack.c.bf16 %v3270_v17, %v3269_v54  ;;  %v3273_v25 = vmul.f32 %v5972_v20, %v3145_v8  ;;  %5993 = vpow2.f32 %v4284_v10  ;;  %v4288_v42 = vmul.f32 -1.442695, %v2215_v22 }
 0x2ed   : > { %v5976_v26 = vpop.eup %5975  ;;  %v4809_v29 = vpack.c.bf16 %v3268_v21, %v3267_v13  ;;  %v2766_v30 = vadd.f32 1.0, %v5974_v23  ;;  %5995 = vpow2.f32 %v4289_v14  ;;  %v3153_v8 = vunpack.c.l.bf16 %v6125_v7  ;;  %v6126_v13 = vld [vmem:[%s6369_s11 + $0x1b0] sm:$0xff]  }
 0x2ee   : > { %v5978_v31 = vpop.eup %5977  ;;  %4934 = vst [vmem:[%s6547_s26 + $0x188] sm:$0xff] %v4814_v24   ;;  %v2764_v33 = vadd.f32 1.0, %v5976_v26  ;;  %5997 = vpow2.f32 %v4287_v18  ;;  %v3151_v14 = vunpack.c.l.bf16 %v6126_v13 }
 0x2ef   : > { %v5980_v34 = vpop.eup %5979  ;;  %4933 = vst [vmem:[%s6547_s26 + $0x180] sm:$0xff] %v4809_v29   ;;  %5999 = vrcp.f32 %v2766_v30  ;;  %v2769_v36 = vadd.f32 1.0, %v5978_v31 }
 0x2f0   : > { %v5982_v38 = vpop.eup %5981  ;;  %6001 = vrcp.f32 %v2764_v33  ;;  %v2767_v41 = vadd.f32 1.0, %v5980_v34  ;;  %v5359_v43 = vpop.f32.mrb[116].mxu1 }
 0x2f1   : > { %v5984_v44 = vpop.eup %5983  ;;  %v3271_v47 = vmul.f32 %v5982_v38, %v3143_v28  ;;  %6003 = vrcp.f32 %v2769_v36  ;;  %v4293_v48 = vmul.f32 -1.442695, %v5359_v43  ;;  %v2228_v49 = vpop.f32.mrb[117].mxu1  ;;  %v3152_v38 = vunpack.c.h.bf16 %v6126_v13 }
 0x2f2   : > { %v5986_v50 = vpop.eup %5985  ;;  %v3274_v51 = vmul.f32 %v5984_v44, %v3146_v32  ;;  %6005 = vrcp.f32 %v2767_v41  ;;  %v4291_v52 = vmul.f32 -1.442695, %v2228_v49  ;;  %v5360_v53 = vpop.f32.mrb[118].mxu1 }
 0x2f3   : > { %v5988_v54 = vpop.eup %5987  ;;  %v3272_v55 = vmul.f32 %v5986_v50, %v3144_v35  ;;  %6007 = vpow2.f32 %v4290_v37  ;;  %v4294_v56 = vmul.f32 -1.442695, %v5360_v53  ;;  %v2231_v57 = vpop.f32.mrb[119].mxu1  ;;  %v3154_v35 = vunpack.c.h.bf16 %v6125_v7 }
 0x2f4   : > { %v5990_v58 = vpop.eup %5989  ;;  %v4824_v59 = vpack.c.bf16 %v3274_v51, %v3273_v25  ;;  %v3277_v60 = vmul.f32 %v5988_v54, %v3149_v40  ;;  %6009 = vpow2.f32 %v4288_v42  ;;  %v4292_v10 = vmul.f32 -1.442695, %v2231_v57  ;;  %v6127_v42 = vld [vmem:[%s6369_s11 + $0x1c8] sm:$0xff]  }
 0x2f5   : > { %v5992_v61 = vpop.eup %5991  ;;  %v4819_v62 = vpack.c.bf16 %v3272_v55, %v3271_v47  ;;  %v3275_v63 = vmul.f32 %v5990_v58, %v3147_v46  ;;  %6011 = vpow2.f32 %v4293_v48  ;;  %v3157_v43 = vunpack.c.l.bf16 %v6127_v42  ;;  %v6128_v48 = vld [vmem:[%s6369_s11 + $0x1c0] sm:$0xff]  }
 0x2f6   : > { %v5994_v0 = vpop.eup %5993  ;;  %4936 = vst [vmem:[%s6547_s26 + $0x198] sm:$0xff] %v4824_v59   ;;  %v2770_v2 = vadd.f32 1.0, %v5992_v61  ;;  %6013 = vpow2.f32 %v4291_v52  ;;  %v3155_v49 = vunpack.c.l.bf16 %v6128_v48 }
 0x2f7   : > { %v5996_v3 = vpop.eup %5995  ;;  %4935 = vst [vmem:[%s6547_s26 + $0x190] sm:$0xff] %v4819_v62   ;;  %v2768_v5 = vadd.f32 1.0, %v5994_v0  ;;  %6015 = vpow2.f32 %v4294_v56 }
 0x2f8   : > { %v5998_v6 = vpop.eup %5997  ;;  %6017 = vrcp.f32 %v2770_v2  ;;  %v2773_v9 = vadd.f32 1.0, %v5996_v3  ;;  %v5363_v11 = vpop.f32.mrb[120].mxu1  ;;  %v3158_v3 = vunpack.c.h.bf16 %v6127_v42 }
 0x2f9   : > { %v6000_v12 = vpop.eup %5999  ;;  %6019 = vrcp.f32 %v2768_v5  ;;  %v2771_v15 = vadd.f32 1.0, %v5998_v6  ;;  %v4297_v16 = vmul.f32 -1.442695, %v5363_v11  ;;  %v2244_v17 = vpop.f32.mrb[121].mxu1  ;;  %v3156_v6 = vunpack.c.h.bf16 %v6128_v48 }
 0x2fa   : > { %v6002_v18 = vpop.eup %6001  ;;  %v3278_v19 = vmul.f32 %v6000_v12, %v3150_v1  ;;  %6021 = vrcp.f32 %v2773_v9  ;;  %v4295_v20 = vmul.f32 -1.442695, %v2244_v17  ;;  %v5364_v21 = vpop.f32.mrb[122].mxu1  ;;  %v6129_v9 = vld [vmem:[%s6369_s11 + $0x1d8] sm:$0xff]  }
 0x2fb   : > { %v6004_v22 = vpop.eup %6003  ;;  %v3276_v23 = vmul.f32 %v6002_v18, %v3148_v4  ;;  %6023 = vrcp.f32 %v2771_v15  ;;  %v4298_v24 = vmul.f32 -1.442695, %v5364_v21  ;;  %v2247_v25 = vpop.f32.mrb[123].mxu1  ;;  %v3162_v18 = vunpack.c.h.bf16 %v6129_v9 }
 0x2fc   : > { %v6006_v26 = vpop.eup %6005  ;;  %v4834_v27 = vpack.c.bf16 %v3278_v19, %v3277_v60  ;;  %v3281_v28 = vmul.f32 %v6004_v22, %v3153_v8  ;;  %6025 = vpow2.f32 %v4292_v10  ;;  %v4296_v45 = vmul.f32 -1.442695, %v2247_v25 }
 0x2fd   : > { %v6008_v29 = vpop.eup %6007  ;;  %v4829_v30 = vpack.c.bf16 %v3276_v23, %v3275_v63  ;;  %v3279_v31 = vmul.f32 %v6006_v26, %v3151_v14  ;;  %6027 = vpow2.f32 %v4297_v16  ;;  %v3161_v10 = vunpack.c.l.bf16 %v6129_v9  ;;  %v6130_v14 = vld [vmem:[%s6369_s11 + $0x1d0] sm:$0xff]  }
 0x2fe   : > { %v6010_v32 = vpop.eup %6009  ;;  %4938 = vst [vmem:[%s6547_s26 + $0x1a8] sm:$0xff] %v4834_v27   ;;  %v2774_v33 = vadd.f32 1.0, %v6008_v29  ;;  %6029 = vpow2.f32 %v4295_v20  ;;  %v3159_v15 = vunpack.c.l.bf16 %v6130_v14 }
 0x2ff   : > { %v6012_v34 = vpop.eup %6011  ;;  %4937 = vst [vmem:[%s6547_s26 + $0x1a0] sm:$0xff] %v4829_v30   ;;  %v2772_v36 = vadd.f32 1.0, %v6010_v32  ;;  %6031 = vpow2.f32 %v4298_v24 }
 0x300   : > { %v6014_v37 = vpop.eup %6013  ;;  %6033 = vrcp.f32 %v2774_v33  ;;  %v2777_v39 = vadd.f32 1.0, %v6012_v34  ;;  %v5367_v40 = vpop.f32.mrb[124].mxu1  ;;  %v6131_v34 = vld [vmem:[%s6369_s11 + $0x1e8] sm:$0xff]  }
 0x301   : > { %v6016_v41 = vpop.eup %6015  ;;  %6035 = vrcp.f32 %v2772_v36  ;;  %v2775_v44 = vadd.f32 1.0, %v6014_v37  ;;  %v2260_v46 = vpop.f32.mrb[125].mxu1  ;;  %v4301_v51 = vmul.f32 -1.442695, %v5367_v40 }
 0x302   : > { %v6018_v47 = vpop.eup %6017  ;;  %6037 = vrcp.f32 %v2777_v39  ;;  %v2778_v50 = vadd.f32 1.0, %v6016_v41  ;;  %v5368_v52 = vpop.f32.mrb[126].mxu1  ;;  %v4299_v55 = vmul.f32 -1.442695, %v2260_v46  ;;  %v6132_v39 = vld [vmem:[%s6369_s11 + $0x1e0] sm:$0xff]  }
 0x303   : > { %v6020_v53 = vpop.eup %6019  ;;  %v3282_v54 = vmul.f32 %v6018_v47, %v3154_v35  ;;  %6039 = vrcp.f32 %v2775_v44  ;;  %v2263_v56 = vpop.f32.mrb[127].mxu1  ;;  %v4302_v59 = vmul.f32 -1.442695, %v5368_v52  ;;  %v3165_v35 = vunpack.c.l.bf16 %v6131_v34 }
 0x304   : > { %v6022_v57 = vpop.eup %6021  ;;  %v3280_v58 = vmul.f32 %v6020_v53, %v3152_v38  ;;  %6041 = vrcp.f32 %v2778_v50  ;;  %v4300_v12 = vmul.f32 -1.442695, %v2263_v56  ;;  %v3163_v40 = vunpack.c.l.bf16 %v6132_v39 }
 0x305   : > { %v6024_v60 = vpop.eup %6023  ;;  %v4844_v61 = vpack.c.bf16 %v3282_v54, %v3281_v28  ;;  %v3285_v62 = vmul.f32 %v6022_v57, %v3157_v43  ;;  %6043 = vpow2.f32 %v4296_v45  ;;  %v3166_v43 = vunpack.c.h.bf16 %v6131_v34  ;;  %v6133_v57 = vld [vmem:[%s6369_s11 + $0x1f8] sm:$0xff]  }
 0x306   : > { %v6026_v63 = vpop.eup %6025  ;;  %v4839_v0 = vpack.c.bf16 %v3280_v58, %v3279_v31  ;;  %v3283_v1 = vmul.f32 %v6024_v60, %v3155_v49  ;;  %6045 = vpow2.f32 %v4301_v51  ;;  %v3160_v31 = vunpack.c.h.bf16 %v6130_v14 }
 0x307   : > { %v6028_v2 = vpop.eup %6027  ;;  %4940 = vst [vmem:[%s6547_s26 + $0x1b8] sm:$0xff] %v4844_v61   ;;  %v2776_v4 = vadd.f32 1.0, %v6026_v63  ;;  %6047 = vpow2.f32 %v4299_v55  ;;  %v3164_v55 = vunpack.c.h.bf16 %v6132_v39  ;;  %v3169_v58 = vunpack.c.l.bf16 %v6133_v57 }
 0x308   : > { %v6030_v5 = vpop.eup %6029  ;;  %4939 = vst [vmem:[%s6547_s26 + $0x1b0] sm:$0xff] %v4839_v0   ;;  %v2781_v7 = vadd.f32 1.0, %v6028_v2  ;;  %6049 = vpow2.f32 %v4302_v59  ;;  %v6134_v59 = vld [vmem:[%s6369_s11 + $0x1f0] sm:$0xff]   ;;  %s3953_s11 = sshll.u32 %s6547_s26, 4  ;;  %s6681_s11 = int_to_ptr.vmem [resolvable:$true] %s3953_s11 }
 0x309   : > { %v6032_v8 = vpop.eup %6031  ;;  %6051 = vrcp.f32 %v2776_v4  ;;  %v2779_v11 = vadd.f32 1.0, %v6030_v5  ;;  %v3167_v60 = vunpack.c.l.bf16 %v6134_v59  ;;  %s6165_s10 = scalar_lea.vmem %s6681_s11, 8192  ;;  %p6172_p8 = scmp.lt.s32.totalorder %s6681_s11, %s6170_s4 }
 0x30a   : > { %v6034_v13 = vpop.eup %6033  ;;  %6053 = vrcp.f32 %v2781_v7  ;;  %v2782_v16 = vadd.f32 1.0, %v6032_v8  ;;  %v3168_v7 = vunpack.c.h.bf16 %v6134_v59  ;;  %p6166_p6 = scmp.ne.s32.totalorder %s6681_s11, %s6165_s10  ;;  %p6173_p10 = scmp.lt.s32.totalorder %s6171_s6, %s6165_s10 }
 0x30b   : > { %v6036_v17 = vpop.eup %6035  ;;  %v3286_v19 = vmul.f32 %v6034_v13, %v3158_v3  ;;  %6055 = vrcp.f32 %v2779_v11 }
 0x30c   : > { %v6038_v20 = vpop.eup %6037  ;;  %v3284_v21 = vmul.f32 %v6036_v17, %v3156_v6  ;;  %6057 = vrcp.f32 %v2782_v16  ;;  %p6167_p12 = pnand %p6166_p6, %p6736_p11  ;;  %p6174_p0 = por %p6173_p10, %p6172_p8 }
 0x30d   : > { %v6040_v22 = vpop.eup %6039  ;;  %v4854_v23 = vpack.c.bf16 %v3286_v19, %v3285_v62  ;;  %v3289_v24 = vmul.f32 %v6038_v20, %v3161_v10  ;;  %6059 = vpow2.f32 %v4300_v12  ;;  %v3170_v62 = vunpack.c.h.bf16 %v6133_v57 }
 0x30e   : > { %v6042_v25 = vpop.eup %6041  ;;  %v4849_v26 = vpack.c.bf16 %v3284_v21, %v3283_v1  ;;  %v3287_v27 = vmul.f32 %v6040_v22, %v3159_v15  ;;  %p6168_p13 = pneg %p6167_p12 }
 0x30f   : > { %v6044_v28 = vpop.eup %6043  ;;  %4942 = vst [vmem:[%s6547_s26 + $0x1c8] sm:$0xff] %v4854_v23   ;;  %v3290_v29 = vmul.f32 %v6042_v25, %v3162_v18 }
 0x310   : > { %v6046_v30 = vpop.eup %6045  ;;  %4941 = vst [vmem:[%s6547_s26 + $0x1c0] sm:$0xff] %v4849_v26   ;;  %v2780_v32 = vadd.f32 1.0, %v6044_v28  ;;  %p6175_p2 = pnand %p6174_p0, %p6168_p13 }
 0x311   : > { %v6048_v33 = vpop.eup %6047  ;;  %v4864_v36 = vpack.c.bf16 %v3290_v29, %v3289_v24  ;;  %v2785_v37 = vadd.f32 1.0, %v6046_v30 }
 0x312   : > { %v6050_v38 = vpop.eup %6049  ;;  %6061 = vrcp.f32 %v2780_v32  ;;  %v2783_v41 = vadd.f32 1.0, %v6048_v33 }
 0x313   : > { %v6052_v42 = vpop.eup %6051  ;;  %4944 = vst [vmem:[%s6547_s26 + $0x1d8] sm:$0xff] %v4864_v36   ;;  %6063 = vrcp.f32 %v2785_v37  ;;  %v2786_v44 = vadd.f32 1.0, %v6050_v38 }
 0x314   : > { %v6054_v45 = vpop.eup %6053  ;;  %v3288_v46 = vmul.f32 %v6052_v42, %v3160_v31  ;;  %6065 = vrcp.f32 %v2783_v41 }
 0x315   : > { %v6056_v47 = vpop.eup %6055  ;;  %v3293_v48 = vmul.f32 %v6054_v45, %v3165_v35  ;;  %6067 = vrcp.f32 %v2786_v44 }
 0x316   : > { %v6058_v49 = vpop.eup %6057  ;;  %v4859_v50 = vpack.c.bf16 %v3288_v46, %v3287_v27  ;;  %v3291_v51 = vmul.f32 %v6056_v47, %v3163_v40 }
 0x317   : > { %v6060_v52 = vpop.eup %6059  ;;  %v3294_v53 = vmul.f32 %v6058_v49, %v3166_v43 }
 0x318   : > { %4943 = vst [vmem:[%s6547_s26 + $0x1d0] sm:$0xff] %v4859_v50   ;;  %v2784_v54 = vadd.f32 1.0, %v6060_v52 }
 0x319   : > { %v4874_v56 = vpack.c.bf16 %v3294_v53, %v3293_v48 }
 0x31a   : > { %6069 = vrcp.f32 %v2784_v54 }
 0x31b   : > { %4946 = vst [vmem:[%s6547_s26 + $0x1e8] sm:$0xff] %v4874_v56  }
 0x31c   : > { %v6062_v61 = vpop.eup %6061 }
 0x31d   : > { %v6064_v63 = vpop.eup %6063  ;;  %v3292_v0 = vmul.f32 %v6062_v61, %v3164_v55 }
 0x31e   : > { %v6066_v1 = vpop.eup %6065  ;;  %v3297_v2 = vmul.f32 %v6064_v63, %v3169_v58 }
 0x31f   : > { %v6068_v3 = vpop.eup %6067  ;;  %v4869_v4 = vpack.c.bf16 %v3292_v0, %v3291_v51  ;;  %v3295_v5 = vmul.f32 %v6066_v1, %v3167_v60 }
 0x320   : > { %v3298_v6 = vmul.f32 %v6068_v3, %v3170_v62 }
 0x321   : > { %4945 = vst [vmem:[%s6547_s26 + $0x1e0] sm:$0xff] %v4869_v4  }
 0x322   : > { %v4884_v8 = vpack.c.bf16 %v3298_v6, %v3297_v2 }
 0x324   : > { %v6070_v9 = vpop.eup %6069  ;;  %4948 = vst [vmem:[%s6547_s26 + $0x1f8] sm:$0xff] %v4884_v8  }
 0x325   : > { %v3296_v10 = vmul.f32 %v6070_v9, %v3168_v7 }
 0x327   : > { %v4879_v11 = vpack.c.bf16 %v3296_v10, %v3295_v5 }
 0x329   : > { %4947 = vst [vmem:[%s6547_s26 + $0x1f0] sm:$0xff] %v4879_v11  }
 0x32a   : > { %6178 = shalt.err (!%p6175_p2)
}
 0x32b   : > { %s6179_s7 = scalar_lea.hbm %s6679_s29, 8192  ;;  %s6183_s19 = scalar_lea.hbm %s6729_s3, 16384 }
 0x32c   : > { %p6180_p4 = scmp.ne.s32.totalorder %s6679_s29, %s6179_s7  ;;  %p6184_p9 = scmp.lt.u32.totalorder %s6679_s29, %s6729_s3 }
 0x32d   : > { %p6185_p1 = scmp.lt.u32.totalorder %s6183_s19, %s6179_s7  ;;  %p6187_p6 = scmp.lt.u32.totalorder %s6179_s7, %s6679_s29 }
 0x32e   : > { %p6181_p5 = pnand %p6180_p4, %p6736_p11 }
 0x32f   : > { %p6186_p3 = por %p6185_p1, %p6184_p9 }
 0x330   : > { %p6182_p7 = pneg %p6181_p5 }
 0x331   : > { %p6188_p12 = por %p6187_p6, %p6186_p3 }
 0x333   : > { %p6189_p13 = pnand %p6188_p12, %p6182_p7 }
 0x335   : > { %6192 = shalt.err (!%p6189_p13)
}
 0x336   : > { %s6237_s22 = smov 64   ;;  %s6238_s26 = smov 4  }
 0x337   : > { %5371 = dma.vmem_to_hbm [thread:$0]  (%p6736_p11), %s6681_s11, 8192, %s6679_s29, %s3940_s30, %s6237_s22, %s6237_s22, %s6238_s26  }
 0x338 PF: > { %s3968_s9 = sand.u32 1, %s6219_s12   ;;  %p6737_p8 = scmp.ne.s32.totalorder %s6734_s25, 0 }
 0x339   : > { %p6738_p10 = scmp.ge.s32.totalorder %s6231_s15, 2  ;;  %s3969_s27 = scalar_lea.sflag [#allocation4], %s3968_s9 }
 0x33b   : > { %p5378_p0 = pnand %p6738_p10, %p6737_p8 }
 0x33d   : > { %6214 = dma.done.wait (!%p5378_p0), %s3969_s27, 8192  }
 0x33e   : > { %6216 = vsyncadd (!%p5378_p0), %s3969_s27, 4294959104  ;;  %p16_p2 = scmp.ge.s32.totalorder %s6284_s18, 4   ;;  %s6739_s12 = smov %s6223_s13 }
 0x33f   : > { %s6740_s13 = smov %s6227_s14  ;;  %s6741_s14 = smov %s6296_s21 }
 0x340   : > { %s6742_s15 = smov %s6284_s18  ;;  %18 = sbr.rel (!%p16_p2) target bundleno = 5 (0x5), region = 77 }
 0x347   :  { %3974 = vsyncpa [#allocation3], 1 }
 0x348   :  { %3976 = vsyncpa [#allocation3 + $0x1], 1 }
 0x349   :  { %3977 = vsyncpa [#allocation4], 1 }
 0x34a   :  { %3979 = vsyncpa [#allocation4 + $0x1], 1 }

</bundles_post_ra>
